<compile_context>
chip_gen: v7x
topology: tpu7x:2x2x1
jax: 0.10.0
libtpu: 0.0.40
codegen_flags: <defaults>
</compile_context>

<pallas_src>
import math

import jax
import jax.numpy as jnp
from jax import lax
from jax.experimental import pallas as pl
from jax.experimental.pallas import tpu as pltpu

# ---------------------------------------------------------------------------
# config (small, consistent with the module's forward)
# ---------------------------------------------------------------------------
BATCH = 2
N_NODE = 8           # n_node (node 0 is the context node)
SENT_DIM = 32
CONCEPT_DIM = 32     # == hidden_size == input_size == output_size of the GNN MP
N_NTYPE = 4
N_ETYPE = 3
N_CONCEPT = 40
N_HEAD = 2           # n_attention_head (concept_dim % n_head == 0)
FC_DIM = 32
N_FC_LAYER = 1
K_LAYERS = 2         # k message-passing layers
INIT_STD = 0.02

NEG_INF = -1e30      # f32-safe large negative for attention masking

assert N_FC_LAYER == 1, "fused kernel implemented for a single MLP hidden layer"
assert CONCEPT_DIM % N_HEAD == 0
assert FC_DIM == CONCEPT_DIM, "fc hidden dim packed into the 32-lane weight slab"

# ---------------------------------------------------------------------------
# packed-weight slab layout (row offsets into the (R_TOTAL, 32) `bigw` slab)
# ---------------------------------------------------------------------------
V_PAD = ((N_CONCEPT + 2 + 7) // 8) * 8          # concept table rows padded to x8  (48)
R_EMB = 0                                       # concept embedding table     (V_PAD rows)
R_SW = R_EMB + V_PAD                            # svec2nvec weight            (S rows)
R_WQ = R_SW + SENT_DIM                          # pooler w_q                  (S rows)
R_VHX = R_WQ + SENT_DIM                         # [Vh_w ; Vx_w]               (2D rows)
R_FC0 = R_VHX + 2 * CONCEPT_DIM                 # fc hidden weight            (2D+S rows)
R_VEC = R_FC0 + (2 * CONCEPT_DIM + SENT_DIM)    # start of the 1-row vectors
RV_SB = R_VEC + 0                               # svec2nvec bias
RV_VHXB = R_VEC + 1                             # Vh_b + Vx_b
RV_BQ = R_VEC + 2
RV_BK = R_VEC + 3
RV_BV = R_VEC + 4
RV_FC0B = R_VEC + 5
RV_LNG = R_VEC + 6
RV_LNB = R_VEC + 7
RV_GB = R_VEC + 8                               # + c   (c = 2*l + m)  GATConv biases
RV_ASRC = RV_GB + 2 * K_LAYERS                  # + c   att_src row vectors
RV_WIA = RV_ASRC + 2 * K_LAYERS                 # + l   importance-gate weight (h1 half)
RV_WIB = RV_WIA + K_LAYERS                      # + l   importance-gate weight (h2 half)
RV_FOW = RV_WIB + K_LAYERS                      # fc_out weight (transposed row)
RV_SCAL = RV_FOW + 1                            # lanes: [bi_0 .. bi_{K-1}, fc_out_b, 0...]
R_TOTAL = ((RV_SCAL + 1 + 7) // 8) * 8


def gelu(x):
    # exact erf-based GELU, matching the reference `GELU` module
    return x * 0.5 * (1.0 + lax.erf(x / math.sqrt(2.0)))


def elu(x):
    # exp only on the clamped branch so the dead branch never overflows
    return jnp.where(x > 0, x, jnp.exp(jnp.minimum(x, 0.0)) - 1.0)


# ---------------------------------------------------------------------------
# the single fused kernel (one program; all B graphs processed together)
# ---------------------------------------------------------------------------
def _fused_gnn_kernel(sv_ref, cid_ref, nt_ref, al_ref, ei_ref, bw_ref, w64_ref,
                      attn_ref, logit_ref):
    f32 = jnp.float32
    B, N = nt_ref.shape
    BN = B * N
    E = ei_ref.shape[1]
    D, S = CONCEPT_DIM, SENT_DIM
    H, dv = N_HEAD, CONCEPT_DIM // N_HEAD
    inv_temp = 1.0 / math.sqrt(dv)

    sv = sv_ref[...]                                              # (B, S) sent_vecs

    # ---- pooler mask (1.0 == masked), built in-kernel --------------------------------
    nt = nt_ref[...]                                              # (B, N) int32
    al = al_ref[...]                                              # (B, 1) int32
    pos = lax.broadcasted_iota(jnp.int32, (B, N), 1)
    maskf = jnp.where((pos >= al) | (nt == 3), 1.0, 0.0)          # (B, N)
    allm = jnp.min(maskf, axis=1, keepdims=True)                  # 1.0 iff every node masked
    maskf = jnp.where((pos == 0) & (allm > 0.5), 0.0, maskf)      # unmask node 0 in that case

    # ---- dense block-diagonal adjacency from the PyG-batched edge list (+ self loops) -
    src = ei_ref[0:1, :]                                          # (1, E) flattened source ids
    dst = ei_ref[1:2, :]                                          # (1, E) flattened target ids
    nid = lax.broadcasted_iota(jnp.int32, (BN, E), 0)
    src_oh = jnp.where(nid == src, 1.0, 0.0)                      # (BN, E)
    dst_oh = jnp.where(nid == dst, 1.0, 0.0)
    deg = lax.dot_general(dst_oh, src_oh, (((1,), (1,)), ((), ())),
                          preferred_element_type=f32)             # deg[i, j] = #edges j -> i
    row = lax.broadcasted_iota(jnp.int32, (BN, BN), 0)
    col = lax.broadcasted_iota(jnp.int32, (BN, BN), 1)
    has_edge = (deg > 0.0) | (row == col)                         # duplicates collapse; + self loops

    # ---- node features: one-hot concept-embedding gather + context row per graph ------
    ctx = gelu(jnp.dot(sv, bw_ref[R_SW:R_SW + S, :], preferred_element_type=f32)
               + bw_ref[RV_SB:RV_SB + 1, :])                      # (B, D)
    idx = cid_ref[...] - 1                                        # (BN, 1) concept_ids - 1
    voc = lax.broadcasted_iota(jnp.int32, (BN, V_PAD), 1)
    onehot = jnp.where(voc == idx, 1.0, 0.0)                      # (BN, V_PAD)
    emb = jnp.dot(onehot, bw_ref[R_EMB:R_EMB + V_PAD, :],
                  preferred_element_type=f32)                     # (BN, D)

    n_iota = lax.broadcasted_iota(jnp.int32, (BN, B), 0)
    b_iota = lax.broadcasted_iota(jnp.int32, (BN, B), 1)
    first = b_iota * N                                            # first node id of graph b
    gsel = jnp.where((n_iota >= first) & (n_iota < first + N), 1.0, 0.0)            # (BN, B)
    is_ctx = jnp.max(jnp.where(n_iota == first, 1.0, 0.0), axis=1, keepdims=True)   # (BN, 1)
    ctx_all = jnp.dot(gsel, ctx, preferred_element_type=f32)      # per-node copy of own ctx row
    H0 = jnp.where(is_ctx > 0.5, ctx_all, emb)                    # (BN, D) gnn_input

    # ---- K ANAGAT layers (dense GAT over the block-diagonal batched graph) ------------
    def gat_conv(h, c):
        # w64[c] = [W | W @ att_dst | 0 ...]: one matmul yields hw and the dst attention term.
        y = jnp.dot(h, w64_ref[c], preferred_element_type=f32)    # (BN, 2D)
        hw = y[:, 0:D]
        a_d = y[:, D:D + 1]                                       # (BN, 1)  att_dst . hw[i]
        a_src = bw_ref[RV_ASRC + c:RV_ASRC + c + 1, :]            # (1, D)
        a_s = lax.dot_general(a_src, hw, (((1,), (1,)), ((), ())),
                              preferred_element_type=f32)         # (1, BN)  att_src . hw[j]
        e = a_d + a_s                                             # (BN, BN)   e[i, j]
        e = jnp.where(e > 0, e, 0.2 * e)                          # LeakyReLU(0.2)
        e = jnp.where(has_edge, e, NEG_INF)                       # real edges + self loops only
        p = jnp.exp(e - jnp.max(e, axis=-1, keepdims=True))
        alpha = p * pl.reciprocal(jnp.sum(p, axis=-1, keepdims=True), approx=True)
        return (jnp.dot(alpha, hw, preferred_element_type=f32)
                + bw_ref[RV_GB + c:RV_GB + c + 1, :])

    X = H0
    for l in range(K_LAYERS):
        h1 = elu(gat_conv(X, 2 * l))
        h2 = elu(gat_conv(h1, 2 * l + 1))
        # importance gate: sigmoid(cat([h1, h2]) @ Wi + bi) via two lane reductions (XLU)
        wia = bw_ref[RV_WIA + l:RV_WIA + l + 1, :]                # (1, D)
        wib = bw_ref[RV_WIB + l:RV_WIB + l + 1, :]
        bi = bw_ref[RV_SCAL:RV_SCAL + 1, l:l + 1]                 # (1, 1)
        s1 = jax.nn.sigmoid(jnp.sum(h1 * wia, axis=-1, keepdims=True)
                            + jnp.sum(h2 * wib, axis=-1, keepdims=True) + bi)
        X = gelu(s1 * h1 + (1.0 - s1) * h2)                       # mp_helper GELU (dropout = id)

    # ---- gnn_output = GELU(Vh(H0) + Vx(X))  (fused into a single (BN,2D)@(2D,D) matmul) -
    out = gelu(jnp.dot(jnp.concatenate([H0, X], axis=1),
                       bw_ref[R_VHX:R_VHX + 2 * D, :], preferred_element_type=f32)
               + bw_ref[RV_VHXB:RV_VHXB + 1, :])                  # (BN, D)

    # ---- pooler projections (K and V fused into one matmul) ---------------------------
    qs = (jnp.dot(sv, bw_ref[R_WQ:R_WQ + S, :], preferred_element_type=f32)
          + bw_ref[RV_BQ:RV_BQ + 1, :])                           # (B, D)
    kv = jnp.dot(out, w64_ref[2 * K_LAYERS], preferred_element_type=f32)   # (BN, 2D)
    ks = kv[:, 0:D] + bw_ref[RV_BK:RV_BK + 1, :]
    vs = kv[:, D:2 * D] + bw_ref[RV_BV:RV_BV + 1, :]

    fc0_w = bw_ref[R_FC0:R_FC0 + 2 * D + S, :]                    # (2D+S, FC)
    lng = bw_ref[RV_LNG:RV_LNG + 1, :]
    lnb = bw_ref[RV_LNB:RV_LNB + 1, :]
    fow = bw_ref[RV_FOW:RV_FOW + 1, :]                            # fc_out weight (as a row)
    fob = bw_ref[RV_SCAL:RV_SCAL + 1, K_LAYERS:K_LAYERS + 1]      # fc_out bias (scalar)

    alphas, logits = [], []
    for b in range(B):                                            # B tiny & static -> unrolled
        mb = maskf[b:b + 1, :]                                    # (1, N)
        sc = jnp.concatenate(
            [lax.dot_general(qs[b:b + 1, h * dv:(h + 1) * dv],
                             ks[b * N:(b + 1) * N, h * dv:(h + 1) * dv],
                             (((1,), (1,)), ((), ())), preferred_element_type=f32)
             for h in range(H)], axis=0) * inv_temp               # (H, N) masked scores
        sc = jnp.where(mb > 0.5, NEG_INF, sc)
        pe = jnp.exp(sc - jnp.max(sc, axis=-1, keepdims=True))
        a = pe * pl.reciprocal(jnp.sum(pe, axis=-1, keepdims=True), approx=True)    # (H, N)
        alphas.append(a)

        pooled = jnp.concatenate(
            [jnp.dot(a[h:h + 1, :], vs[b * N:(b + 1) * N, h * dv:(h + 1) * dv],
                     preferred_element_type=f32) for h in range(H)], axis=1)        # (1, D)

        # fc input = cat([graph_vecs, sent_vecs, Z_vecs]) -> single matmul with fc0_w
        cat = jnp.concatenate([pooled, sv[b:b + 1, :], out[b * N:b * N + 1, :]], axis=1)
        hfc = jnp.dot(cat, fc0_w, preferred_element_type=f32) + bw_ref[RV_FC0B:RV_FC0B + 1, :]
        # MLP hidden layer: (dropout = id) -> LayerNorm -> GELU, then output Linear
        mu = jnp.mean(hfc, axis=-1, keepdims=True)
        var = jnp.mean((hfc - mu) * (hfc - mu), axis=-1, keepdims=True)
        hln = gelu((hfc - mu) * lax.rsqrt(var + 1e-5) * lng + lnb)
        logits.append(jnp.sum(hln * fow, axis=-1, keepdims=True) + fob)             # (1, 1)

    # attention in the torch (n_head*B, N) head-major layout -> no host-side transpose
    attn_ref[...] = jnp.concatenate(
        [alphas[b][h:h + 1, :] for h in range(H) for b in range(B)], axis=0)
    logit_ref[...] = jnp.concatenate(logits, axis=0)


# ---------------------------------------------------------------------------
# host-side wrapper
# ---------------------------------------------------------------------------
def _full_spec(shape):
    nd = len(shape)
    return pl.BlockSpec(tuple(shape), lambda i, _nd=nd: (0,) * _nd)


def pack_params(p):
    """Pack all weights into two VMEM slabs. Weight-only; call once outside the hot path."""
    D = CONCEPT_DIM
    gat = p['gat']
    rows = [p['concept_emb'],
            jnp.zeros((V_PAD - p['concept_emb'].shape[0], D), jnp.float32),
            p['svec2nvec_w'], p['wq'],
            p['Vh_w'], p['Vx_w'],
            p['fc0_w'],
            p['svec2nvec_b'], p['Vh_b'] + p['Vx_b'],
            p['bq'], p['bk'], p['bv'],
            p['fc0_b'], p['fc0_ln_g'], p['fc0_ln_b']]
    rows += [gat[l][f'b{m + 1}'] for l in range(K_LAYERS) for m in range(2)]
    rows += [gat[l][f'as{m + 1}'] for l in range(K_LAYERS) for m in range(2)]
    rows += [gat[l]['wia'].T for l in range(K_LAYERS)]
    rows += [gat[l]['wib'].T for l in range(K_LAYERS)]
    rows += [p['fc_out_w'].T]
    rows += [jnp.concatenate([gat[l]['bi'] for l in range(K_LAYERS)]
                             + [p['fc_out_b'],
                                jnp.zeros((1, D - K_LAYERS - 1), jnp.float32)], axis=1)]
    bigw = jnp.concatenate(rows, axis=0)
    assert bigw.shape == (RV_SCAL + 1, D), bigw.shape
    bigw = jnp.concatenate(
        [bigw, jnp.zeros((R_TOTAL - bigw.shape[0], D), jnp.float32)], axis=0)

    slabs = []
    for l in range(K_LAYERS):
        for m in range(2):
            W = gat[l][f'w{m + 1}']
            c_dst = jnp.dot(W, gat[l][f'ad{m + 1}'])                        # (D, 1) W @ att_dst
            slabs.append(jnp.concatenate(
                [W, c_dst, jnp.zeros((D, D - 1), jnp.float32)], axis=1))    # (D, 2D)
    slabs.append(jnp.concatenate([p['wk'], p['wv']], axis=1))               # fused [wk | wv]
    w64 = jnp.stack(slabs)                                                  # (2K+1, D, 2D)
    return bigw, w64


def gnn_forward(packed, sent_vecs, concept_ids, node_type_ids, node_scores, adj_lengths, adj):
    """Forward of GNN (return_contrastive=False): returns (logits, pool_attn)."""
    del node_scores          # only feeds the unused _node_feature_extra in the reference
    bigw, w64 = packed
    edge_index, _edge_type = adj   # edge_type only feeds the never-called edge_encoder
    B, N = node_type_ids.shape
    H = N_HEAD

    sv = sent_vecs.astype(jnp.float32)                            # (B, S)
    cid = concept_ids.reshape(B * N, 1).astype(jnp.int32)         # (B*N, 1) flattened ids
    nt = node_type_ids.astype(jnp.int32)                          # (B, N)
    al = adj_lengths.reshape(B, 1).astype(jnp.int32)              # (B, 1)
    ei = edge_index.astype(jnp.int32)                             # (2, E) flattened PyG ids

    pool_attn, logits = pl.pallas_call(
        _fused_gnn_kernel,
        out_shape=(jax.ShapeDtypeStruct((H * B, N), jnp.float32),
                   jax.ShapeDtypeStruct((B, 1), jnp.float32)),
        grid=(1,),                                                # single program, no pipelining
        in_specs=[_full_spec(x.shape) for x in (sv, cid, nt, al, ei, bigw, w64)],
        out_specs=(_full_spec((H * B, N)), _full_spec((B, 1))),
        compiler_params=pltpu.CompilerParams(dimension_semantics=("arbitrary",)),
    )(sv, cid, nt, al, ei, bigw, w64)
    return logits, pool_attn


# ---------------------------------------------------------------------------
# deterministic parameter init (normal(0, 0.02) weights, zero biases, LN = 1/0)
# ---------------------------------------------------------------------------
def init_params(key):
    keys = iter(jax.random.split(key, 64))

    def w(shape):
        return jax.random.normal(next(keys), shape, jnp.float32) * INIT_STD

    z = lambda shape: jnp.zeros(shape, jnp.float32)
    p = {}
    p['concept_emb'] = w((N_CONCEPT + 2, CONCEPT_DIM))
    p['svec2nvec_w'] = w((SENT_DIM, CONCEPT_DIM)); p['svec2nvec_b'] = z((1, CONCEPT_DIM))
    p['gat'] = []
    for _ in range(K_LAYERS):
        p['gat'].append({
            'w1': w((CONCEPT_DIM, CONCEPT_DIM)), 'b1': z((1, CONCEPT_DIM)),
            'as1': w((1, CONCEPT_DIM)), 'ad1': w((CONCEPT_DIM, 1)),
            'w2': w((CONCEPT_DIM, CONCEPT_DIM)), 'b2': z((1, CONCEPT_DIM)),
            'as2': w((1, CONCEPT_DIM)), 'ad2': w((CONCEPT_DIM, 1)),
            'wia': w((CONCEPT_DIM, 1)), 'wib': w((CONCEPT_DIM, 1)), 'bi': z((1, 1)),
        })
    p['Vh_w'] = w((CONCEPT_DIM, CONCEPT_DIM)); p['Vh_b'] = z((1, CONCEPT_DIM))
    p['Vx_w'] = w((CONCEPT_DIM, CONCEPT_DIM)); p['Vx_b'] = z((1, CONCEPT_DIM))
    d_k = CONCEPT_DIM // N_HEAD
    p['wq'] = w((SENT_DIM, N_HEAD * d_k)); p['bq'] = z((1, N_HEAD * d_k))
    p['wk'] = w((CONCEPT_DIM, N_HEAD * d_k)); p['bk'] = z((1, N_HEAD * d_k))
    p['wv'] = w((CONCEPT_DIM, N_HEAD * d_k)); p['bv'] = z((1, N_HEAD * d_k))
    in_dim = 2 * CONCEPT_DIM + SENT_DIM
    p['fc0_w'] = w((in_dim, FC_DIM)); p['fc0_b'] = z((1, FC_DIM))
    p['fc0_ln_g'] = jnp.ones((1, FC_DIM), jnp.float32); p['fc0_ln_b'] = z((1, FC_DIM))
    p['fc_out_w'] = w((FC_DIM, 1)); p['fc_out_b'] = z((1, 1))
    return p


# ---------------------------------------------------------------------------
if __name__ == "__main__":
    params = init_params(jax.random.PRNGKey(0))
    packed = pack_params(params)     # one-time, weight-only packing (outside the jit hot path)

    k1, k2, k3, k4 = jax.random.split(jax.random.PRNGKey(0), 4)
    sent_vecs = jax.random.normal(k1, (BATCH, SENT_DIM), jnp.float32)
    concept_ids = jax.random.randint(k2, (BATCH, N_NODE), 1, N_CONCEPT + 1).astype(jnp.int32)
    node_type_ids = jnp.concatenate(
        [jnp.full((BATCH, 1), 3, jnp.int32),
         jax.random.randint(k3, (BATCH, N_NODE - 1), 0, 3).astype(jnp.int32)], axis=1)
    node_scores = jax.random.normal(k4, (BATCH, N_NODE, 1), jnp.float32)
    adj_lengths = jnp.array([N_NODE, 5], dtype=jnp.int32)

    # PyG-batched (flattened) edge_index: row 0 = source, row 1 = target
    edge_index = jnp.array([[0, 1, 2, 3, 1, 4, 5, 8, 9, 10, 11, 9],
                            [1, 2, 3, 0, 0, 5, 0, 9, 10, 8, 12, 8]], dtype=jnp.int32)
    edge_type = jnp.array([0, 1, 2, 0, 1, 2, 0, 1, 2, 0, 1, 2], dtype=jnp.int32)  # unused by MP

    fwd = jax.jit(gnn_forward)
    logits, pool_attn = fwd(packed, sent_vecs, concept_ids, node_type_ids,
                            node_scores, adj_lengths, (edge_index, edge_type))
    jax.block_until_ready((logits, pool_attn))

    assert logits.shape == (BATCH, 1)
    assert pool_attn.shape == (N_HEAD * BATCH, N_NODE)
    assert bool(jnp.all(jnp.isfinite(logits))) and bool(jnp.all(jnp.isfinite(pool_attn)))
    print("KERNEL_OK")
</pallas_src>

<mosaic_0001>
module attributes {stable_mosaic.version = 11 : i64} {
  func.func @_fused_gnn_kernel(%arg0: i32, %arg1: memref<2x32xf32, #tpu.memory_space<vmem>>, %arg2: memref<16x1xi32, #tpu.memory_space<vmem>>, %arg3: memref<2x8xi32, #tpu.memory_space<vmem>>, %arg4: memref<2x1xi32, #tpu.memory_space<vmem>>, %arg5: memref<2x12xi32, #tpu.memory_space<vmem>>, %arg6: memref<296x32xf32, #tpu.memory_space<vmem>>, %arg7: memref<5x32x64xf32, #tpu.memory_space<vmem>>, %arg8: memref<4x8xf32, #tpu.memory_space<vmem>>, %arg9: memref<2x1xf32, #tpu.memory_space<vmem>>) attributes {dimension_semantics = [#tpu.dimension_semantics<arbitrary>], iteration_bounds = array<i64: 1>, scalar_prefetch = 0 : i64, scratch_operands = 0 : i64, tpu.core_type = #tpu.core_type<tc>, window_params = [{pipeline_mode = #tpu.pipeline_mode<synchronous>, transform_indices = @transform_0, window_bounds = array<i64: 2, 32>}, {pipeline_mode = #tpu.pipeline_mode<synchronous>, transform_indices = @transform_1, window_bounds = array<i64: 16, 1>}, {pipeline_mode = #tpu.pipeline_mode<synchronous>, transform_indices = @transform_2, window_bounds = array<i64: 2, 8>}, {pipeline_mode = #tpu.pipeline_mode<synchronous>, transform_indices = @transform_3, window_bounds = array<i64: 2, 1>}, {pipeline_mode = #tpu.pipeline_mode<synchronous>, transform_indices = @transform_4, window_bounds = array<i64: 2, 12>}, {pipeline_mode = #tpu.pipeline_mode<synchronous>, transform_indices = @transform_5, window_bounds = array<i64: 296, 32>}, {pipeline_mode = #tpu.pipeline_mode<synchronous>, transform_indices = @transform_6, window_bounds = array<i64: 5, 32, 64>}, {pipeline_mode = #tpu.pipeline_mode<synchronous>, transform_indices = @transform_7, window_bounds = array<i64: 4, 8>}, {pipeline_mode = #tpu.pipeline_mode<synchronous>, transform_indices = @transform_8, window_bounds = array<i64: 2, 1>}]} {
    %c0 = arith.constant 0 : index
    %c0_0 = arith.constant 0 : index
    %0 = vector.load %arg1[%c0, %c0_0] : memref<2x32xf32, #tpu.memory_space<vmem>>, vector<2x32xf32>
    %c0_1 = arith.constant 0 : index
    %c0_2 = arith.constant 0 : index
    %1 = vector.load %arg3[%c0_1, %c0_2] : memref<2x8xi32, #tpu.memory_space<vmem>>, vector<2x8xi32>
    %c0_3 = arith.constant 0 : index
    %c0_4 = arith.constant 0 : index
    %2 = vector.load %arg4[%c0_3, %c0_4] : memref<2x1xi32, #tpu.memory_space<vmem>>, vector<2x1xi32>
    %3 = tpu.iota {dimensions = array<i32: 1>} : vector<2x8xi32>
    %4 = vector.broadcast %2 : vector<2x1xi32> to vector<2x8xi32>
    %5 = arith.cmpi sge, %3, %4 : vector<2x8xi32>
    %c3_i32 = arith.constant 3 : i32
    %6 = vector.broadcast %c3_i32 : i32 to vector<2x8xi32>
    %7 = arith.cmpi eq, %1, %6 : vector<2x8xi32>
    %8 = arith.ori %5, %7 : vector<2x8xi1>
    %cst = arith.constant 1.000000e+00 : f32
    %cst_5 = arith.constant 0.000000e+00 : f32
    %9 = vector.broadcast %cst : f32 to vector<2x8xf32>
    %10 = vector.broadcast %cst_5 : f32 to vector<2x8xf32>
    %11 = arith.select %8, %9, %10 : vector<2x8xi1>, vector<2x8xf32>
    %cst_6 = arith.constant dense<0x7F800000> : vector<2xf32>
    %12 = vector.multi_reduction <minimumf>, %11, %cst_6 [1] : vector<2x8xf32> to vector<2xf32>
    %13 = vector.shape_cast %12 : vector<2xf32> to vector<2x1xf32>
    %c0_i32 = arith.constant 0 : i32
    %14 = vector.broadcast %c0_i32 : i32 to vector<2x8xi32>
    %15 = arith.cmpi eq, %3, %14 : vector<2x8xi32>
    %cst_7 = arith.constant 5.000000e-01 : f32
    %16 = vector.broadcast %cst_7 : f32 to vector<2x1xf32>
    %17 = arith.cmpf ogt, %13, %16 : vector<2x1xf32>
    %18 = vector.broadcast %17 : vector<2x1xi1> to vector<2x8xi1>
    %19 = arith.andi %15, %18 : vector<2x8xi1>
    %cst_8 = arith.constant 0.000000e+00 : f32
    %20 = vector.broadcast %cst_8 : f32 to vector<2x8xf32>
    %21 = arith.select %19, %20, %11 : vector<2x8xi1>, vector<2x8xf32>
    %c0_9 = arith.constant 0 : index
    %c0_10 = arith.constant 0 : index
    %22 = vector.load %arg5[%c0_9, %c0_10] : memref<2x12xi32, #tpu.memory_space<vmem>>, vector<1x12xi32>
    %c1 = arith.constant 1 : index
    %c0_11 = arith.constant 0 : index
    %23 = vector.load %arg5[%c1, %c0_11] : memref<2x12xi32, #tpu.memory_space<vmem>>, vector<1x12xi32>
    %24 = tpu.iota {dimensions = array<i32: 0>} : vector<16x12xi32>
    %25 = vector.broadcast %22 : vector<1x12xi32> to vector<16x12xi32>
    %26 = arith.cmpi eq, %24, %25 : vector<16x12xi32>
    %cst_12 = arith.constant 1.000000e+00 : f32
    %cst_13 = arith.constant 0.000000e+00 : f32
    %27 = vector.broadcast %cst_12 : f32 to vector<16x12xf32>
    %28 = vector.broadcast %cst_13 : f32 to vector<16x12xf32>
    %29 = arith.select %26, %27, %28 : vector<16x12xi1>, vector<16x12xf32>
    %30 = vector.broadcast %23 : vector<1x12xi32> to vector<16x12xi32>
    %31 = arith.cmpi eq, %24, %30 : vector<16x12xi32>
    %cst_14 = arith.constant 1.000000e+00 : f32
    %cst_15 = arith.constant 0.000000e+00 : f32
    %32 = vector.broadcast %cst_14 : f32 to vector<16x12xf32>
    %33 = vector.broadcast %cst_15 : f32 to vector<16x12xf32>
    %34 = arith.select %31, %32, %33 : vector<16x12xi1>, vector<16x12xf32>
    %cst_16 = arith.constant dense<0.000000e+00> : vector<16x16xf32>
    %35 = tpu.matmul %34, %29, %cst_16 {dimension_numbers = #tpu.dot_dimension_numbers<[1], [1], [0], [0], [0, 0, 1, 0], [], []>} : vector<16x12xf32>, vector<16x12xf32>, vector<16x16xf32> -> vector<16x16xf32>
    %36 = tpu.iota {dimensions = array<i32: 0>} : vector<16x16xi32>
    %37 = tpu.iota {dimensions = array<i32: 1>} : vector<16x16xi32>
    %cst_17 = arith.constant 0.000000e+00 : f32
    %38 = vector.broadcast %cst_17 : f32 to vector<16x16xf32>
    %39 = arith.cmpf ogt, %35, %38 : vector<16x16xf32>
    %40 = arith.cmpi eq, %36, %37 : vector<16x16xi32>
    %41 = arith.ori %39, %40 : vector<16x16xi1>
    %c48 = arith.constant 48 : index
    %c0_18 = arith.constant 0 : index
    %42 = vector.load %arg6[%c48, %c0_18] : memref<296x32xf32, #tpu.memory_space<vmem>>, vector<32x32xf32>
    %cst_19 = arith.constant dense<0.000000e+00> : vector<2x32xf32>
    %43 = tpu.matmul %0, %42, %cst_19 {dimension_numbers = #tpu.dot_dimension_numbers<[1], [0], [0], [1], [0, 0, 1, 1], [], []>} : vector<2x32xf32>, vector<32x32xf32>, vector<2x32xf32> -> vector<2x32xf32>
    %c272 = arith.constant 272 : index
    %c0_20 = arith.constant 0 : index
    %44 = vector.load %arg6[%c272, %c0_20] : memref<296x32xf32, #tpu.memory_space<vmem>>, vector<1x32xf32>
    %45 = vector.broadcast %44 : vector<1x32xf32> to vector<2x32xf32>
    %46 = arith.addf %43, %45 : vector<2x32xf32>
    %cst_21 = arith.constant 5.000000e-01 : f32
    %47 = vector.broadcast %cst_21 : f32 to vector<2x32xf32>
    %48 = arith.mulf %46, %47 : vector<2x32xf32>
    %cst_22 = arith.constant 1.41421354 : f32
    %49 = vector.broadcast %cst_22 : f32 to vector<2x32xf32>
    %50 = arith.divf %46, %49 : vector<2x32xf32>
    %51 = math.erf %50 : vector<2x32xf32>
    %cst_23 = arith.constant 1.000000e+00 : f32
    %52 = vector.broadcast %cst_23 : f32 to vector<2x32xf32>
    %53 = arith.addf %52, %51 : vector<2x32xf32>
    %54 = arith.mulf %48, %53 : vector<2x32xf32>
    %c0_24 = arith.constant 0 : index
    %c0_25 = arith.constant 0 : index
    %55 = vector.load %arg2[%c0_24, %c0_25] : memref<16x1xi32, #tpu.memory_space<vmem>>, vector<16x1xi32>
    %c1_i32 = arith.constant 1 : i32
    %56 = vector.broadcast %c1_i32 : i32 to vector<16x1xi32>
    %57 = arith.subi %55, %56 : vector<16x1xi32>
    %58 = tpu.iota {dimensions = array<i32: 1>} : vector<16x48xi32>
    %59 = vector.broadcast %57 : vector<16x1xi32> to vector<16x48xi32>
    %60 = arith.cmpi eq, %58, %59 : vector<16x48xi32>
    %cst_26 = arith.constant 1.000000e+00 : f32
    %cst_27 = arith.constant 0.000000e+00 : f32
    %61 = vector.broadcast %cst_26 : f32 to vector<16x48xf32>
    %62 = vector.broadcast %cst_27 : f32 to vector<16x48xf32>
    %63 = arith.select %60, %61, %62 : vector<16x48xi1>, vector<16x48xf32>
    %c0_28 = arith.constant 0 : index
    %c0_29 = arith.constant 0 : index
    %64 = vector.load %arg6[%c0_28, %c0_29] : memref<296x32xf32, #tpu.memory_space<vmem>>, vector<48x32xf32>
    %cst_30 = arith.constant dense<0.000000e+00> : vector<16x32xf32>
    %65 = tpu.matmul %63, %64, %cst_30 {dimension_numbers = #tpu.dot_dimension_numbers<[1], [0], [0], [1], [0, 0, 1, 1], [], []>} : vector<16x48xf32>, vector<48x32xf32>, vector<16x32xf32> -> vector<16x32xf32>
    %66 = tpu.iota {dimensions = array<i32: 0>} : vector<16x2xi32>
    %67 = tpu.iota {dimensions = array<i32: 1>} : vector<16x2xi32>
    %c8_i32 = arith.constant 8 : i32
    %68 = vector.broadcast %c8_i32 : i32 to vector<16x2xi32>
    %69 = arith.muli %67, %68 : vector<16x2xi32>
    %70 = arith.cmpi sge, %66, %69 : vector<16x2xi32>
    %c8_i32_31 = arith.constant 8 : i32
    %71 = vector.broadcast %c8_i32_31 : i32 to vector<16x2xi32>
    %72 = arith.addi %69, %71 : vector<16x2xi32>
    %73 = arith.cmpi slt, %66, %72 : vector<16x2xi32>
    %74 = arith.andi %70, %73 : vector<16x2xi1>
    %cst_32 = arith.constant 1.000000e+00 : f32
    %cst_33 = arith.constant 0.000000e+00 : f32
    %75 = vector.broadcast %cst_32 : f32 to vector<16x2xf32>
    %76 = vector.broadcast %cst_33 : f32 to vector<16x2xf32>
    %77 = arith.select %74, %75, %76 : vector<16x2xi1>, vector<16x2xf32>
    %78 = arith.cmpi eq, %66, %69 : vector<16x2xi32>
    %cst_34 = arith.constant 1.000000e+00 : f32
    %cst_35 = arith.constant 0.000000e+00 : f32
    %79 = vector.broadcast %cst_34 : f32 to vector<16x2xf32>
    %80 = vector.broadcast %cst_35 : f32 to vector<16x2xf32>
    %81 = arith.select %78, %79, %80 : vector<16x2xi1>, vector<16x2xf32>
    %cst_36 = arith.constant dense<0xFF800000> : vector<16xf32>
    %82 = vector.multi_reduction <maximumf>, %81, %cst_36 [1] : vector<16x2xf32> to vector<16xf32>
    %83 = vector.shape_cast %82 : vector<16xf32> to vector<16x1xf32>
    %cst_37 = arith.constant dense<0.000000e+00> : vector<16x32xf32>
    %84 = tpu.matmul %77, %54, %cst_37 {dimension_numbers = #tpu.dot_dimension_numbers<[1], [0], [0], [1], [0, 0, 1, 1], [], []>} : vector<16x2xf32>, vector<2x32xf32>, vector<16x32xf32> -> vector<16x32xf32>
    %cst_38 = arith.constant 5.000000e-01 : f32
    %85 = vector.broadcast %cst_38 : f32 to vector<16x1xf32>
    %86 = arith.cmpf ogt, %83, %85 : vector<16x1xf32>
    %87 = vector.shape_cast %86 : vector<16x1xi1> to vector<16x1xi1>
    %88 = vector.broadcast %87 : vector<16x1xi1> to vector<16x32xi1>
    %89 = arith.select %88, %84, %65 : vector<16x32xi1>, vector<16x32xf32>
    %c0_39 = arith.constant 0 : index
    %c0_40 = arith.constant 0 : index
    %c0_41 = arith.constant 0 : index
    %90 = vector.load %arg7[%c0_39, %c0_40, %c0_41] : memref<5x32x64xf32, #tpu.memory_space<vmem>>, vector<1x32x64xf32>
    %91 = vector.shape_cast %90 : vector<1x32x64xf32> to vector<32x64xf32>
    %cst_42 = arith.constant dense<0.000000e+00> : vector<16x64xf32>
    %92 = tpu.matmul %89, %91, %cst_42 {dimension_numbers = #tpu.dot_dimension_numbers<[1], [0], [0], [1], [0, 0, 1, 1], [], []>} : vector<16x32xf32>, vector<32x64xf32>, vector<16x64xf32> -> vector<16x64xf32>
    %93 = vector.extract_strided_slice %92 {offsets = [0, 0], sizes = [16, 32], strides = [1, 1]} : vector<16x64xf32> to vector<16x32xf32>
    %94 = vector.extract_strided_slice %92 {offsets = [0, 32], sizes = [16, 1], strides = [1, 1]} : vector<16x64xf32> to vector<16x1xf32>
    %c284 = arith.constant 284 : index
    %c0_43 = arith.constant 0 : index
    %95 = vector.load %arg6[%c284, %c0_43] : memref<296x32xf32, #tpu.memory_space<vmem>>, vector<1x32xf32>
    %cst_44 = arith.constant dense<0.000000e+00> : vector<1x16xf32>
    %96 = tpu.matmul %95, %93, %cst_44 {dimension_numbers = #tpu.dot_dimension_numbers<[1], [1], [0], [0], [0, 0, 1, 0], [], []>} : vector<1x32xf32>, vector<16x32xf32>, vector<1x16xf32> -> vector<1x16xf32>
    %97 = vector.broadcast %94 : vector<16x1xf32> to vector<16x16xf32>
    %98 = vector.broadcast %96 : vector<1x16xf32> to vector<16x16xf32>
    %99 = arith.addf %97, %98 : vector<16x16xf32>
    %cst_45 = arith.constant 0.000000e+00 : f32
    %100 = vector.broadcast %cst_45 : f32 to vector<16x16xf32>
    %101 = arith.cmpf ogt, %99, %100 : vector<16x16xf32>
    %cst_46 = arith.constant 2.000000e-01 : f32
    %102 = vector.broadcast %cst_46 : f32 to vector<16x16xf32>
    %103 = arith.mulf %102, %99 : vector<16x16xf32>
    %104 = arith.select %101, %99, %103 : vector<16x16xi1>, vector<16x16xf32>
    %cst_47 = arith.constant -1.000000e+30 : f32
    %105 = vector.broadcast %cst_47 : f32 to vector<16x16xf32>
    %106 = arith.select %41, %104, %105 : vector<16x16xi1>, vector<16x16xf32>
    %cst_48 = arith.constant dense<0xFF800000> : vector<16xf32>
    %107 = vector.multi_reduction <maximumf>, %106, %cst_48 [1] : vector<16x16xf32> to vector<16xf32>
    %108 = vector.shape_cast %107 : vector<16xf32> to vector<16x1xf32>
    %109 = vector.broadcast %108 : vector<16x1xf32> to vector<16x16xf32>
    %110 = arith.subf %106, %109 : vector<16x16xf32>
    %111 = math.exp %110 : vector<16x16xf32>
    %cst_49 = arith.constant dense<0.000000e+00> : vector<16xf32>
    %112 = vector.multi_reduction <add>, %111, %cst_49 [1] : vector<16x16xf32> to vector<16xf32>
    %113 = vector.shape_cast %112 : vector<16xf32> to vector<16x1xf32>
    %114 = tpu.reciprocal %113 {approx = true} : vector<16x1xf32> -> vector<16x1xf32>
    %115 = vector.broadcast %114 : vector<16x1xf32> to vector<16x16xf32>
    %116 = arith.mulf %111, %115 : vector<16x16xf32>
    %cst_50 = arith.constant dense<0.000000e+00> : vector<16x32xf32>
    %117 = tpu.matmul %116, %93, %cst_50 {dimension_numbers = #tpu.dot_dimension_numbers<[1], [0], [0], [1], [0, 0, 1, 1], [], []>} : vector<16x16xf32>, vector<16x32xf32>, vector<16x32xf32> -> vector<16x32xf32>
    %c280 = arith.constant 280 : index
    %c0_51 = arith.constant 0 : index
    %118 = vector.load %arg6[%c280, %c0_51] : memref<296x32xf32, #tpu.memory_space<vmem>>, vector<1x32xf32>
    %119 = vector.broadcast %118 : vector<1x32xf32> to vector<16x32xf32>
    %120 = arith.addf %117, %119 : vector<16x32xf32>
    %cst_52 = arith.constant 0.000000e+00 : f32
    %121 = vector.broadcast %cst_52 : f32 to vector<16x32xf32>
    %122 = arith.cmpf ogt, %120, %121 : vector<16x32xf32>
    %cst_53 = arith.constant 0.000000e+00 : f32
    %123 = vector.broadcast %cst_53 : f32 to vector<16x32xf32>
    %124 = arith.minimumf %120, %123 : vector<16x32xf32>
    %125 = math.exp %124 : vector<16x32xf32>
    %cst_54 = arith.constant 1.000000e+00 : f32
    %126 = vector.broadcast %cst_54 : f32 to vector<16x32xf32>
    %127 = arith.subf %125, %126 : vector<16x32xf32>
    %128 = arith.select %122, %120, %127 : vector<16x32xi1>, vector<16x32xf32>
    %c1_55 = arith.constant 1 : index
    %c0_56 = arith.constant 0 : index
    %c0_57 = arith.constant 0 : index
    %129 = vector.load %arg7[%c1_55, %c0_56, %c0_57] : memref<5x32x64xf32, #tpu.memory_space<vmem>>, vector<1x32x64xf32>
    %130 = vector.shape_cast %129 : vector<1x32x64xf32> to vector<32x64xf32>
    %cst_58 = arith.constant dense<0.000000e+00> : vector<16x64xf32>
    %131 = tpu.matmul %128, %130, %cst_58 {dimension_numbers = #tpu.dot_dimension_numbers<[1], [0], [0], [1], [0, 0, 1, 1], [], []>} : vector<16x32xf32>, vector<32x64xf32>, vector<16x64xf32> -> vector<16x64xf32>
    %132 = vector.extract_strided_slice %131 {offsets = [0, 0], sizes = [16, 32], strides = [1, 1]} : vector<16x64xf32> to vector<16x32xf32>
    %133 = vector.extract_strided_slice %131 {offsets = [0, 32], sizes = [16, 1], strides = [1, 1]} : vector<16x64xf32> to vector<16x1xf32>
    %c285 = arith.constant 285 : index
    %c0_59 = arith.constant 0 : index
    %134 = vector.load %arg6[%c285, %c0_59] : memref<296x32xf32, #tpu.memory_space<vmem>>, vector<1x32xf32>
    %cst_60 = arith.constant dense<0.000000e+00> : vector<1x16xf32>
    %135 = tpu.matmul %134, %132, %cst_60 {dimension_numbers = #tpu.dot_dimension_numbers<[1], [1], [0], [0], [0, 0, 1, 0], [], []>} : vector<1x32xf32>, vector<16x32xf32>, vector<1x16xf32> -> vector<1x16xf32>
    %136 = vector.broadcast %133 : vector<16x1xf32> to vector<16x16xf32>
    %137 = vector.broadcast %135 : vector<1x16xf32> to vector<16x16xf32>
    %138 = arith.addf %136, %137 : vector<16x16xf32>
    %cst_61 = arith.constant 0.000000e+00 : f32
    %139 = vector.broadcast %cst_61 : f32 to vector<16x16xf32>
    %140 = arith.cmpf ogt, %138, %139 : vector<16x16xf32>
    %cst_62 = arith.constant 2.000000e-01 : f32
    %141 = vector.broadcast %cst_62 : f32 to vector<16x16xf32>
    %142 = arith.mulf %141, %138 : vector<16x16xf32>
    %143 = arith.select %140, %138, %142 : vector<16x16xi1>, vector<16x16xf32>
    %cst_63 = arith.constant -1.000000e+30 : f32
    %144 = vector.broadcast %cst_63 : f32 to vector<16x16xf32>
    %145 = arith.select %41, %143, %144 : vector<16x16xi1>, vector<16x16xf32>
    %cst_64 = arith.constant dense<0xFF800000> : vector<16xf32>
    %146 = vector.multi_reduction <maximumf>, %145, %cst_64 [1] : vector<16x16xf32> to vector<16xf32>
    %147 = vector.shape_cast %146 : vector<16xf32> to vector<16x1xf32>
    %148 = vector.broadcast %147 : vector<16x1xf32> to vector<16x16xf32>
    %149 = arith.subf %145, %148 : vector<16x16xf32>
    %150 = math.exp %149 : vector<16x16xf32>
    %cst_65 = arith.constant dense<0.000000e+00> : vector<16xf32>
    %151 = vector.multi_reduction <add>, %150, %cst_65 [1] : vector<16x16xf32> to vector<16xf32>
    %152 = vector.shape_cast %151 : vector<16xf32> to vector<16x1xf32>
    %153 = tpu.reciprocal %152 {approx = true} : vector<16x1xf32> -> vector<16x1xf32>
    %154 = vector.broadcast %153 : vector<16x1xf32> to vector<16x16xf32>
    %155 = arith.mulf %150, %154 : vector<16x16xf32>
    %cst_66 = arith.constant dense<0.000000e+00> : vector<16x32xf32>
    %156 = tpu.matmul %155, %132, %cst_66 {dimension_numbers = #tpu.dot_dimension_numbers<[1], [0], [0], [1], [0, 0, 1, 1], [], []>} : vector<16x16xf32>, vector<16x32xf32>, vector<16x32xf32> -> vector<16x32xf32>
    %c281 = arith.constant 281 : index
    %c0_67 = arith.constant 0 : index
    %157 = vector.load %arg6[%c281, %c0_67] : memref<296x32xf32, #tpu.memory_space<vmem>>, vector<1x32xf32>
    %158 = vector.broadcast %157 : vector<1x32xf32> to vector<16x32xf32>
    %159 = arith.addf %156, %158 : vector<16x32xf32>
    %cst_68 = arith.constant 0.000000e+00 : f32
    %160 = vector.broadcast %cst_68 : f32 to vector<16x32xf32>
    %161 = arith.cmpf ogt, %159, %160 : vector<16x32xf32>
    %cst_69 = arith.constant 0.000000e+00 : f32
    %162 = vector.broadcast %cst_69 : f32 to vector<16x32xf32>
    %163 = arith.minimumf %159, %162 : vector<16x32xf32>
    %164 = math.exp %163 : vector<16x32xf32>
    %cst_70 = arith.constant 1.000000e+00 : f32
    %165 = vector.broadcast %cst_70 : f32 to vector<16x32xf32>
    %166 = arith.subf %164, %165 : vector<16x32xf32>
    %167 = arith.select %161, %159, %166 : vector<16x32xi1>, vector<16x32xf32>
    %c288 = arith.constant 288 : index
    %c0_71 = arith.constant 0 : index
    %168 = vector.load %arg6[%c288, %c0_71] : memref<296x32xf32, #tpu.memory_space<vmem>>, vector<1x32xf32>
    %c290 = arith.constant 290 : index
    %c0_72 = arith.constant 0 : index
    %169 = vector.load %arg6[%c290, %c0_72] : memref<296x32xf32, #tpu.memory_space<vmem>>, vector<1x32xf32>
    %c293 = arith.constant 293 : index
    %c0_73 = arith.constant 0 : index
    %170 = vector.load %arg6[%c293, %c0_73] : memref<296x32xf32, #tpu.memory_space<vmem>>, vector<1x1xf32>
    %171 = vector.broadcast %168 : vector<1x32xf32> to vector<16x32xf32>
    %172 = arith.mulf %128, %171 : vector<16x32xf32>
    %cst_74 = arith.constant dense<0.000000e+00> : vector<16xf32>
    %173 = vector.multi_reduction <add>, %172, %cst_74 [1] : vector<16x32xf32> to vector<16xf32>
    %174 = vector.shape_cast %173 : vector<16xf32> to vector<16x1xf32>
    %175 = vector.broadcast %169 : vector<1x32xf32> to vector<16x32xf32>
    %176 = arith.mulf %167, %175 : vector<16x32xf32>
    %cst_75 = arith.constant dense<0.000000e+00> : vector<16xf32>
    %177 = vector.multi_reduction <add>, %176, %cst_75 [1] : vector<16x32xf32> to vector<16xf32>
    %178 = vector.shape_cast %177 : vector<16xf32> to vector<16x1xf32>
    %179 = arith.addf %174, %178 : vector<16x1xf32>
    %180 = vector.broadcast %170 : vector<1x1xf32> to vector<16x1xf32>
    %181 = arith.addf %179, %180 : vector<16x1xf32>
    %182 = arith.negf %181 : vector<16x1xf32>
    %183 = math.exp %182 : vector<16x1xf32>
    %cst_76 = arith.constant 1.000000e+00 : f32
    %184 = vector.broadcast %cst_76 : f32 to vector<16x1xf32>
    %185 = arith.addf %184, %183 : vector<16x1xf32>
    %186 = arith.divf %184, %185 : vector<16x1xf32>
    %187 = vector.broadcast %186 : vector<16x1xf32> to vector<16x32xf32>
    %188 = arith.mulf %187, %128 : vector<16x32xf32>
    %cst_77 = arith.constant 1.000000e+00 : f32
    %189 = vector.broadcast %cst_77 : f32 to vector<16x1xf32>
    %190 = arith.subf %189, %186 : vector<16x1xf32>
    %191 = vector.broadcast %190 : vector<16x1xf32> to vector<16x32xf32>
    %192 = arith.mulf %191, %167 : vector<16x32xf32>
    %193 = arith.addf %188, %192 : vector<16x32xf32>
    %cst_78 = arith.constant 5.000000e-01 : f32
    %194 = vector.broadcast %cst_78 : f32 to vector<16x32xf32>
    %195 = arith.mulf %193, %194 : vector<16x32xf32>
    %cst_79 = arith.constant 1.41421354 : f32
    %196 = vector.broadcast %cst_79 : f32 to vector<16x32xf32>
    %197 = arith.divf %193, %196 : vector<16x32xf32>
    %198 = math.erf %197 : vector<16x32xf32>
    %cst_80 = arith.constant 1.000000e+00 : f32
    %199 = vector.broadcast %cst_80 : f32 to vector<16x32xf32>
    %200 = arith.addf %199, %198 : vector<16x32xf32>
    %201 = arith.mulf %195, %200 : vector<16x32xf32>
    %c2 = arith.constant 2 : index
    %c0_81 = arith.constant 0 : index
    %c0_82 = arith.constant 0 : index
    %202 = vector.load %arg7[%c2, %c0_81, %c0_82] : memref<5x32x64xf32, #tpu.memory_space<vmem>>, vector<1x32x64xf32>
    %203 = vector.shape_cast %202 : vector<1x32x64xf32> to vector<32x64xf32>
    %cst_83 = arith.constant dense<0.000000e+00> : vector<16x64xf32>
    %204 = tpu.matmul %201, %203, %cst_83 {dimension_numbers = #tpu.dot_dimension_numbers<[1], [0], [0], [1], [0, 0, 1, 1], [], []>} : vector<16x32xf32>, vector<32x64xf32>, vector<16x64xf32> -> vector<16x64xf32>
    %205 = vector.extract_strided_slice %204 {offsets = [0, 0], sizes = [16, 32], strides = [1, 1]} : vector<16x64xf32> to vector<16x32xf32>
    %206 = vector.extract_strided_slice %204 {offsets = [0, 32], sizes = [16, 1], strides = [1, 1]} : vector<16x64xf32> to vector<16x1xf32>
    %c286 = arith.constant 286 : index
    %c0_84 = arith.constant 0 : index
    %207 = vector.load %arg6[%c286, %c0_84] : memref<296x32xf32, #tpu.memory_space<vmem>>, vector<1x32xf32>
    %cst_85 = arith.constant dense<0.000000e+00> : vector<1x16xf32>
    %208 = tpu.matmul %207, %205, %cst_85 {dimension_numbers = #tpu.dot_dimension_numbers<[1], [1], [0], [0], [0, 0, 1, 0], [], []>} : vector<1x32xf32>, vector<16x32xf32>, vector<1x16xf32> -> vector<1x16xf32>
    %209 = vector.broadcast %206 : vector<16x1xf32> to vector<16x16xf32>
    %210 = vector.broadcast %208 : vector<1x16xf32> to vector<16x16xf32>
    %211 = arith.addf %209, %210 : vector<16x16xf32>
    %cst_86 = arith.constant 0.000000e+00 : f32
    %212 = vector.broadcast %cst_86 : f32 to vector<16x16xf32>
    %213 = arith.cmpf ogt, %211, %212 : vector<16x16xf32>
    %cst_87 = arith.constant 2.000000e-01 : f32
    %214 = vector.broadcast %cst_87 : f32 to vector<16x16xf32>
    %215 = arith.mulf %214, %211 : vector<16x16xf32>
    %216 = arith.select %213, %211, %215 : vector<16x16xi1>, vector<16x16xf32>
    %cst_88 = arith.constant -1.000000e+30 : f32
    %217 = vector.broadcast %cst_88 : f32 to vector<16x16xf32>
    %218 = arith.select %41, %216, %217 : vector<16x16xi1>, vector<16x16xf32>
    %cst_89 = arith.constant dense<0xFF800000> : vector<16xf32>
    %219 = vector.multi_reduction <maximumf>, %218, %cst_89 [1] : vector<16x16xf32> to vector<16xf32>
    %220 = vector.shape_cast %219 : vector<16xf32> to vector<16x1xf32>
    %221 = vector.broadcast %220 : vector<16x1xf32> to vector<16x16xf32>
    %222 = arith.subf %218, %221 : vector<16x16xf32>
    %223 = math.exp %222 : vector<16x16xf32>
    %cst_90 = arith.constant dense<0.000000e+00> : vector<16xf32>
    %224 = vector.multi_reduction <add>, %223, %cst_90 [1] : vector<16x16xf32> to vector<16xf32>
    %225 = vector.shape_cast %224 : vector<16xf32> to vector<16x1xf32>
    %226 = tpu.reciprocal %225 {approx = true} : vector<16x1xf32> -> vector<16x1xf32>
    %227 = vector.broadcast %226 : vector<16x1xf32> to vector<16x16xf32>
    %228 = arith.mulf %223, %227 : vector<16x16xf32>
    %cst_91 = arith.constant dense<0.000000e+00> : vector<16x32xf32>
    %229 = tpu.matmul %228, %205, %cst_91 {dimension_numbers = #tpu.dot_dimension_numbers<[1], [0], [0], [1], [0, 0, 1, 1], [], []>} : vector<16x16xf32>, vector<16x32xf32>, vector<16x32xf32> -> vector<16x32xf32>
    %c282 = arith.constant 282 : index
    %c0_92 = arith.constant 0 : index
    %230 = vector.load %arg6[%c282, %c0_92] : memref<296x32xf32, #tpu.memory_space<vmem>>, vector<1x32xf32>
    %231 = vector.broadcast %230 : vector<1x32xf32> to vector<16x32xf32>
    %232 = arith.addf %229, %231 : vector<16x32xf32>
    %cst_93 = arith.constant 0.000000e+00 : f32
    %233 = vector.broadcast %cst_93 : f32 to vector<16x32xf32>
    %234 = arith.cmpf ogt, %232, %233 : vector<16x32xf32>
    %cst_94 = arith.constant 0.000000e+00 : f32
    %235 = vector.broadcast %cst_94 : f32 to vector<16x32xf32>
    %236 = arith.minimumf %232, %235 : vector<16x32xf32>
    %237 = math.exp %236 : vector<16x32xf32>
    %cst_95 = arith.constant 1.000000e+00 : f32
    %238 = vector.broadcast %cst_95 : f32 to vector<16x32xf32>
    %239 = arith.subf %237, %238 : vector<16x32xf32>
    %240 = arith.select %234, %232, %239 : vector<16x32xi1>, vector<16x32xf32>
    %c3 = arith.constant 3 : index
    %c0_96 = arith.constant 0 : index
    %c0_97 = arith.constant 0 : index
    %241 = vector.load %arg7[%c3, %c0_96, %c0_97] : memref<5x32x64xf32, #tpu.memory_space<vmem>>, vector<1x32x64xf32>
    %242 = vector.shape_cast %241 : vector<1x32x64xf32> to vector<32x64xf32>
    %cst_98 = arith.constant dense<0.000000e+00> : vector<16x64xf32>
    %243 = tpu.matmul %240, %242, %cst_98 {dimension_numbers = #tpu.dot_dimension_numbers<[1], [0], [0], [1], [0, 0, 1, 1], [], []>} : vector<16x32xf32>, vector<32x64xf32>, vector<16x64xf32> -> vector<16x64xf32>
    %244 = vector.extract_strided_slice %243 {offsets = [0, 0], sizes = [16, 32], strides = [1, 1]} : vector<16x64xf32> to vector<16x32xf32>
    %245 = vector.extract_strided_slice %243 {offsets = [0, 32], sizes = [16, 1], strides = [1, 1]} : vector<16x64xf32> to vector<16x1xf32>
    %c287 = arith.constant 287 : index
    %c0_99 = arith.constant 0 : index
    %246 = vector.load %arg6[%c287, %c0_99] : memref<296x32xf32, #tpu.memory_space<vmem>>, vector<1x32xf32>
    %cst_100 = arith.constant dense<0.000000e+00> : vector<1x16xf32>
    %247 = tpu.matmul %246, %244, %cst_100 {dimension_numbers = #tpu.dot_dimension_numbers<[1], [1], [0], [0], [0, 0, 1, 0], [], []>} : vector<1x32xf32>, vector<16x32xf32>, vector<1x16xf32> -> vector<1x16xf32>
    %248 = vector.broadcast %245 : vector<16x1xf32> to vector<16x16xf32>
    %249 = vector.broadcast %247 : vector<1x16xf32> to vector<16x16xf32>
    %250 = arith.addf %248, %249 : vector<16x16xf32>
    %cst_101 = arith.constant 0.000000e+00 : f32
    %251 = vector.broadcast %cst_101 : f32 to vector<16x16xf32>
    %252 = arith.cmpf ogt, %250, %251 : vector<16x16xf32>
    %cst_102 = arith.constant 2.000000e-01 : f32
    %253 = vector.broadcast %cst_102 : f32 to vector<16x16xf32>
    %254 = arith.mulf %253, %250 : vector<16x16xf32>
    %255 = arith.select %252, %250, %254 : vector<16x16xi1>, vector<16x16xf32>
    %cst_103 = arith.constant -1.000000e+30 : f32
    %256 = vector.broadcast %cst_103 : f32 to vector<16x16xf32>
    %257 = arith.select %41, %255, %256 : vector<16x16xi1>, vector<16x16xf32>
    %cst_104 = arith.constant dense<0xFF800000> : vector<16xf32>
    %258 = vector.multi_reduction <maximumf>, %257, %cst_104 [1] : vector<16x16xf32> to vector<16xf32>
    %259 = vector.shape_cast %258 : vector<16xf32> to vector<16x1xf32>
    %260 = vector.broadcast %259 : vector<16x1xf32> to vector<16x16xf32>
    %261 = arith.subf %257, %260 : vector<16x16xf32>
    %262 = math.exp %261 : vector<16x16xf32>
    %cst_105 = arith.constant dense<0.000000e+00> : vector<16xf32>
    %263 = vector.multi_reduction <add>, %262, %cst_105 [1] : vector<16x16xf32> to vector<16xf32>
    %264 = vector.shape_cast %263 : vector<16xf32> to vector<16x1xf32>
    %265 = tpu.reciprocal %264 {approx = true} : vector<16x1xf32> -> vector<16x1xf32>
    %266 = vector.broadcast %265 : vector<16x1xf32> to vector<16x16xf32>
    %267 = arith.mulf %262, %266 : vector<16x16xf32>
    %cst_106 = arith.constant dense<0.000000e+00> : vector<16x32xf32>
    %268 = tpu.matmul %267, %244, %cst_106 {dimension_numbers = #tpu.dot_dimension_numbers<[1], [0], [0], [1], [0, 0, 1, 1], [], []>} : vector<16x16xf32>, vector<16x32xf32>, vector<16x32xf32> -> vector<16x32xf32>
    %c283 = arith.constant 283 : index
    %c0_107 = arith.constant 0 : index
    %269 = vector.load %arg6[%c283, %c0_107] : memref<296x32xf32, #tpu.memory_space<vmem>>, vector<1x32xf32>
    %270 = vector.broadcast %269 : vector<1x32xf32> to vector<16x32xf32>
    %271 = arith.addf %268, %270 : vector<16x32xf32>
    %cst_108 = arith.constant 0.000000e+00 : f32
    %272 = vector.broadcast %cst_108 : f32 to vector<16x32xf32>
    %273 = arith.cmpf ogt, %271, %272 : vector<16x32xf32>
    %cst_109 = arith.constant 0.000000e+00 : f32
    %274 = vector.broadcast %cst_109 : f32 to vector<16x32xf32>
    %275 = arith.minimumf %271, %274 : vector<16x32xf32>
    %276 = math.exp %275 : vector<16x32xf32>
    %cst_110 = arith.constant 1.000000e+00 : f32
    %277 = vector.broadcast %cst_110 : f32 to vector<16x32xf32>
    %278 = arith.subf %276, %277 : vector<16x32xf32>
    %279 = arith.select %273, %271, %278 : vector<16x32xi1>, vector<16x32xf32>
    %c289 = arith.constant 289 : index
    %c0_111 = arith.constant 0 : index
    %280 = vector.load %arg6[%c289, %c0_111] : memref<296x32xf32, #tpu.memory_space<vmem>>, vector<1x32xf32>
    %c291 = arith.constant 291 : index
    %c0_112 = arith.constant 0 : index
    %281 = vector.load %arg6[%c291, %c0_112] : memref<296x32xf32, #tpu.memory_space<vmem>>, vector<1x32xf32>
    %c293_113 = arith.constant 293 : index
    %c1_114 = arith.constant 1 : index
    %282 = vector.load %arg6[%c293_113, %c1_114] : memref<296x32xf32, #tpu.memory_space<vmem>>, vector<1x1xf32>
    %283 = vector.broadcast %280 : vector<1x32xf32> to vector<16x32xf32>
    %284 = arith.mulf %240, %283 : vector<16x32xf32>
    %cst_115 = arith.constant dense<0.000000e+00> : vector<16xf32>
    %285 = vector.multi_reduction <add>, %284, %cst_115 [1] : vector<16x32xf32> to vector<16xf32>
    %286 = vector.shape_cast %285 : vector<16xf32> to vector<16x1xf32>
    %287 = vector.broadcast %281 : vector<1x32xf32> to vector<16x32xf32>
    %288 = arith.mulf %279, %287 : vector<16x32xf32>
    %cst_116 = arith.constant dense<0.000000e+00> : vector<16xf32>
    %289 = vector.multi_reduction <add>, %288, %cst_116 [1] : vector<16x32xf32> to vector<16xf32>
    %290 = vector.shape_cast %289 : vector<16xf32> to vector<16x1xf32>
    %291 = arith.addf %286, %290 : vector<16x1xf32>
    %292 = vector.broadcast %282 : vector<1x1xf32> to vector<16x1xf32>
    %293 = arith.addf %291, %292 : vector<16x1xf32>
    %294 = arith.negf %293 : vector<16x1xf32>
    %295 = math.exp %294 : vector<16x1xf32>
    %cst_117 = arith.constant 1.000000e+00 : f32
    %296 = vector.broadcast %cst_117 : f32 to vector<16x1xf32>
    %297 = arith.addf %296, %295 : vector<16x1xf32>
    %298 = arith.divf %296, %297 : vector<16x1xf32>
    %299 = vector.broadcast %298 : vector<16x1xf32> to vector<16x32xf32>
    %300 = arith.mulf %299, %240 : vector<16x32xf32>
    %cst_118 = arith.constant 1.000000e+00 : f32
    %301 = vector.broadcast %cst_118 : f32 to vector<16x1xf32>
    %302 = arith.subf %301, %298 : vector<16x1xf32>
    %303 = vector.broadcast %302 : vector<16x1xf32> to vector<16x32xf32>
    %304 = arith.mulf %303, %279 : vector<16x32xf32>
    %305 = arith.addf %300, %304 : vector<16x32xf32>
    %cst_119 = arith.constant 5.000000e-01 : f32
    %306 = vector.broadcast %cst_119 : f32 to vector<16x32xf32>
    %307 = arith.mulf %305, %306 : vector<16x32xf32>
    %cst_120 = arith.constant 1.41421354 : f32
    %308 = vector.broadcast %cst_120 : f32 to vector<16x32xf32>
    %309 = arith.divf %305, %308 : vector<16x32xf32>
    %310 = math.erf %309 : vector<16x32xf32>
    %cst_121 = arith.constant 1.000000e+00 : f32
    %311 = vector.broadcast %cst_121 : f32 to vector<16x32xf32>
    %312 = arith.addf %311, %310 : vector<16x32xf32>
    %313 = arith.mulf %307, %312 : vector<16x32xf32>
    %314 = tpu.concatenate %89, %313 in 1 : vector<16x32xf32>, vector<16x32xf32> -> vector<16x64xf32>
    %c112 = arith.constant 112 : index
    %c0_122 = arith.constant 0 : index
    %315 = vector.load %arg6[%c112, %c0_122] : memref<296x32xf32, #tpu.memory_space<vmem>>, vector<64x32xf32>
    %cst_123 = arith.constant dense<0.000000e+00> : vector<16x32xf32>
    %316 = tpu.matmul %314, %315, %cst_123 {dimension_numbers = #tpu.dot_dimension_numbers<[1], [0], [0], [1], [0, 0, 1, 1], [], []>} : vector<16x64xf32>, vector<64x32xf32>, vector<16x32xf32> -> vector<16x32xf32>
    %c273 = arith.constant 273 : index
    %c0_124 = arith.constant 0 : index
    %317 = vector.load %arg6[%c273, %c0_124] : memref<296x32xf32, #tpu.memory_space<vmem>>, vector<1x32xf32>
    %318 = vector.broadcast %317 : vector<1x32xf32> to vector<16x32xf32>
    %319 = arith.addf %316, %318 : vector<16x32xf32>
    %cst_125 = arith.constant 5.000000e-01 : f32
    %320 = vector.broadcast %cst_125 : f32 to vector<16x32xf32>
    %321 = arith.mulf %319, %320 : vector<16x32xf32>
    %cst_126 = arith.constant 1.41421354 : f32
    %322 = vector.broadcast %cst_126 : f32 to vector<16x32xf32>
    %323 = arith.divf %319, %322 : vector<16x32xf32>
    %324 = math.erf %323 : vector<16x32xf32>
    %cst_127 = arith.constant 1.000000e+00 : f32
    %325 = vector.broadcast %cst_127 : f32 to vector<16x32xf32>
    %326 = arith.addf %325, %324 : vector<16x32xf32>
    %327 = arith.mulf %321, %326 : vector<16x32xf32>
    %c80 = arith.constant 80 : index
    %c0_128 = arith.constant 0 : index
    %328 = vector.load %arg6[%c80, %c0_128] : memref<296x32xf32, #tpu.memory_space<vmem>>, vector<32x32xf32>
    %cst_129 = arith.constant dense<0.000000e+00> : vector<2x32xf32>
    %329 = tpu.matmul %0, %328, %cst_129 {dimension_numbers = #tpu.dot_dimension_numbers<[1], [0], [0], [1], [0, 0, 1, 1], [], []>} : vector<2x32xf32>, vector<32x32xf32>, vector<2x32xf32> -> vector<2x32xf32>
    %c274 = arith.constant 274 : index
    %c0_130 = arith.constant 0 : index
    %330 = vector.load %arg6[%c274, %c0_130] : memref<296x32xf32, #tpu.memory_space<vmem>>, vector<1x32xf32>
    %331 = vector.broadcast %330 : vector<1x32xf32> to vector<2x32xf32>
    %332 = arith.addf %329, %331 : vector<2x32xf32>
    %c4 = arith.constant 4 : index
    %c0_131 = arith.constant 0 : index
    %c0_132 = arith.constant 0 : index
    %333 = vector.load %arg7[%c4, %c0_131, %c0_132] : memref<5x32x64xf32, #tpu.memory_space<vmem>>, vector<1x32x64xf32>
    %334 = vector.shape_cast %333 : vector<1x32x64xf32> to vector<32x64xf32>
    %cst_133 = arith.constant dense<0.000000e+00> : vector<16x64xf32>
    %335 = tpu.matmul %327, %334, %cst_133 {dimension_numbers = #tpu.dot_dimension_numbers<[1], [0], [0], [1], [0, 0, 1, 1], [], []>} : vector<16x32xf32>, vector<32x64xf32>, vector<16x64xf32> -> vector<16x64xf32>
    %336 = vector.extract_strided_slice %335 {offsets = [0, 0], sizes = [16, 32], strides = [1, 1]} : vector<16x64xf32> to vector<16x32xf32>
    %c275 = arith.constant 275 : index
    %c0_134 = arith.constant 0 : index
    %337 = vector.load %arg6[%c275, %c0_134] : memref<296x32xf32, #tpu.memory_space<vmem>>, vector<1x32xf32>
    %338 = vector.broadcast %337 : vector<1x32xf32> to vector<16x32xf32>
    %339 = arith.addf %336, %338 : vector<16x32xf32>
    %340 = vector.extract_strided_slice %335 {offsets = [0, 32], sizes = [16, 32], strides = [1, 1]} : vector<16x64xf32> to vector<16x32xf32>
    %c276 = arith.constant 276 : index
    %c0_135 = arith.constant 0 : index
    %341 = vector.load %arg6[%c276, %c0_135] : memref<296x32xf32, #tpu.memory_space<vmem>>, vector<1x32xf32>
    %342 = vector.broadcast %341 : vector<1x32xf32> to vector<16x32xf32>
    %343 = arith.addf %340, %342 : vector<16x32xf32>
    %c176 = arith.constant 176 : index
    %c0_136 = arith.constant 0 : index
    %344 = vector.load %arg6[%c176, %c0_136] : memref<296x32xf32, #tpu.memory_space<vmem>>, vector<96x32xf32>
    %c278 = arith.constant 278 : index
    %c0_137 = arith.constant 0 : index
    %345 = vector.load %arg6[%c278, %c0_137] : memref<296x32xf32, #tpu.memory_space<vmem>>, vector<1x32xf32>
    %c279 = arith.constant 279 : index
    %c0_138 = arith.constant 0 : index
    %346 = vector.load %arg6[%c279, %c0_138] : memref<296x32xf32, #tpu.memory_space<vmem>>, vector<1x32xf32>
    %c292 = arith.constant 292 : index
    %c0_139 = arith.constant 0 : index
    %347 = vector.load %arg6[%c292, %c0_139] : memref<296x32xf32, #tpu.memory_space<vmem>>, vector<1x32xf32>
    %c293_140 = arith.constant 293 : index
    %c2_141 = arith.constant 2 : index
    %348 = vector.load %arg6[%c293_140, %c2_141] : memref<296x32xf32, #tpu.memory_space<vmem>>, vector<1x1xf32>
    %349 = vector.extract_strided_slice %21 {offsets = [0, 0], sizes = [1, 8], strides = [1, 1]} : vector<2x8xf32> to vector<1x8xf32>
    %350 = vector.extract_strided_slice %332 {offsets = [0, 0], sizes = [1, 16], strides = [1, 1]} : vector<2x32xf32> to vector<1x16xf32>
    %351 = vector.extract_strided_slice %339 {offsets = [0, 0], sizes = [8, 16], strides = [1, 1]} : vector<16x32xf32> to vector<8x16xf32>
    %cst_142 = arith.constant dense<0.000000e+00> : vector<1x8xf32>
    %352 = tpu.matmul %350, %351, %cst_142 {dimension_numbers = #tpu.dot_dimension_numbers<[1], [1], [0], [0], [0, 0, 1, 0], [], []>} : vector<1x16xf32>, vector<8x16xf32>, vector<1x8xf32> -> vector<1x8xf32>
    %353 = vector.extract_strided_slice %332 {offsets = [0, 16], sizes = [1, 16], strides = [1, 1]} : vector<2x32xf32> to vector<1x16xf32>
    %354 = vector.extract_strided_slice %339 {offsets = [0, 16], sizes = [8, 16], strides = [1, 1]} : vector<16x32xf32> to vector<8x16xf32>
    %cst_143 = arith.constant dense<0.000000e+00> : vector<1x8xf32>
    %355 = tpu.matmul %353, %354, %cst_143 {dimension_numbers = #tpu.dot_dimension_numbers<[1], [1], [0], [0], [0, 0, 1, 0], [], []>} : vector<1x16xf32>, vector<8x16xf32>, vector<1x8xf32> -> vector<1x8xf32>
    %356 = tpu.concatenate %352, %355 in 0 : vector<1x8xf32>, vector<1x8xf32> -> vector<2x8xf32>
    %cst_144 = arith.constant 2.500000e-01 : f32
    %357 = vector.broadcast %cst_144 : f32 to vector<2x8xf32>
    %358 = arith.mulf %356, %357 : vector<2x8xf32>
    %cst_145 = arith.constant 5.000000e-01 : f32
    %359 = vector.broadcast %cst_145 : f32 to vector<1x8xf32>
    %360 = arith.cmpf ogt, %349, %359 : vector<1x8xf32>
    %cst_146 = arith.constant -1.000000e+30 : f32
    %361 = vector.shape_cast %360 : vector<1x8xi1> to vector<1x8xi1>
    %362 = vector.broadcast %361 : vector<1x8xi1> to vector<2x8xi1>
    %363 = vector.broadcast %cst_146 : f32 to vector<2x8xf32>
    %364 = arith.select %362, %363, %358 : vector<2x8xi1>, vector<2x8xf32>
    %cst_147 = arith.constant dense<0xFF800000> : vector<2xf32>
    %365 = vector.multi_reduction <maximumf>, %364, %cst_147 [1] : vector<2x8xf32> to vector<2xf32>
    %366 = vector.shape_cast %365 : vector<2xf32> to vector<2x1xf32>
    %367 = vector.broadcast %366 : vector<2x1xf32> to vector<2x8xf32>
    %368 = arith.subf %364, %367 : vector<2x8xf32>
    %369 = math.exp %368 : vector<2x8xf32>
    %cst_148 = arith.constant dense<0.000000e+00> : vector<2xf32>
    %370 = vector.multi_reduction <add>, %369, %cst_148 [1] : vector<2x8xf32> to vector<2xf32>
    %371 = vector.shape_cast %370 : vector<2xf32> to vector<2x1xf32>
    %372 = tpu.reciprocal %371 {approx = true} : vector<2x1xf32> -> vector<2x1xf32>
    %373 = vector.broadcast %372 : vector<2x1xf32> to vector<2x8xf32>
    %374 = arith.mulf %369, %373 : vector<2x8xf32>
    %375 = vector.extract_strided_slice %374 {offsets = [0, 0], sizes = [1, 8], strides = [1, 1]} : vector<2x8xf32> to vector<1x8xf32>
    %376 = vector.extract_strided_slice %343 {offsets = [0, 0], sizes = [8, 16], strides = [1, 1]} : vector<16x32xf32> to vector<8x16xf32>
    %cst_149 = arith.constant dense<0.000000e+00> : vector<1x16xf32>
    %377 = tpu.matmul %375, %376, %cst_149 {dimension_numbers = #tpu.dot_dimension_numbers<[1], [0], [0], [1], [0, 0, 1, 1], [], []>} : vector<1x8xf32>, vector<8x16xf32>, vector<1x16xf32> -> vector<1x16xf32>
    %378 = vector.extract_strided_slice %374 {offsets = [1, 0], sizes = [1, 8], strides = [1, 1]} : vector<2x8xf32> to vector<1x8xf32>
    %379 = vector.extract_strided_slice %343 {offsets = [0, 16], sizes = [8, 16], strides = [1, 1]} : vector<16x32xf32> to vector<8x16xf32>
    %cst_150 = arith.constant dense<0.000000e+00> : vector<1x16xf32>
    %380 = tpu.matmul %378, %379, %cst_150 {dimension_numbers = #tpu.dot_dimension_numbers<[1], [0], [0], [1], [0, 0, 1, 1], [], []>} : vector<1x8xf32>, vector<8x16xf32>, vector<1x16xf32> -> vector<1x16xf32>
    %381 = tpu.concatenate %377, %380 in 1 : vector<1x16xf32>, vector<1x16xf32> -> vector<1x32xf32>
    %382 = vector.extract_strided_slice %0 {offsets = [0, 0], sizes = [1, 32], strides = [1, 1]} : vector<2x32xf32> to vector<1x32xf32>
    %383 = vector.extract_strided_slice %327 {offsets = [0, 0], sizes = [1, 32], strides = [1, 1]} : vector<16x32xf32> to vector<1x32xf32>
    %384 = tpu.concatenate %381, %382, %383 in 1 : vector<1x32xf32>, vector<1x32xf32>, vector<1x32xf32> -> vector<1x96xf32>
    %cst_151 = arith.constant dense<0.000000e+00> : vector<1x32xf32>
    %385 = tpu.matmul %384, %344, %cst_151 {dimension_numbers = #tpu.dot_dimension_numbers<[1], [0], [0], [1], [0, 0, 1, 1], [], []>} : vector<1x96xf32>, vector<96x32xf32>, vector<1x32xf32> -> vector<1x32xf32>
    %c277 = arith.constant 277 : index
    %c0_152 = arith.constant 0 : index
    %386 = vector.load %arg6[%c277, %c0_152] : memref<296x32xf32, #tpu.memory_space<vmem>>, vector<1x32xf32>
    %387 = arith.addf %385, %386 : vector<1x32xf32>
    %cst_153 = arith.constant dense<0.000000e+00> : vector<1xf32>
    %388 = vector.multi_reduction <add>, %387, %cst_153 [1] : vector<1x32xf32> to vector<1xf32>
    %389 = vector.shape_cast %388 : vector<1xf32> to vector<1x1xf32>
    %cst_154 = arith.constant 3.200000e+01 : f32
    %390 = vector.broadcast %cst_154 : f32 to vector<1x1xf32>
    %391 = arith.divf %389, %390 : vector<1x1xf32>
    %392 = vector.broadcast %391 : vector<1x1xf32> to vector<1x32xf32>
    %393 = arith.subf %387, %392 : vector<1x32xf32>
    %394 = vector.broadcast %391 : vector<1x1xf32> to vector<1x32xf32>
    %395 = arith.subf %387, %394 : vector<1x32xf32>
    %396 = arith.mulf %393, %395 : vector<1x32xf32>
    %cst_155 = arith.constant dense<0.000000e+00> : vector<1xf32>
    %397 = vector.multi_reduction <add>, %396, %cst_155 [1] : vector<1x32xf32> to vector<1xf32>
    %398 = vector.shape_cast %397 : vector<1xf32> to vector<1x1xf32>
    %cst_156 = arith.constant 3.200000e+01 : f32
    %399 = vector.broadcast %cst_156 : f32 to vector<1x1xf32>
    %400 = arith.divf %398, %399 : vector<1x1xf32>
    %401 = vector.broadcast %391 : vector<1x1xf32> to vector<1x32xf32>
    %402 = arith.subf %387, %401 : vector<1x32xf32>
    %cst_157 = arith.constant 9.99999974E-6 : f32
    %403 = vector.broadcast %cst_157 : f32 to vector<1x1xf32>
    %404 = arith.addf %400, %403 : vector<1x1xf32>
    %405 = math.rsqrt %404 : vector<1x1xf32>
    %406 = vector.broadcast %405 : vector<1x1xf32> to vector<1x32xf32>
    %407 = arith.mulf %402, %406 : vector<1x32xf32>
    %408 = arith.mulf %407, %345 : vector<1x32xf32>
    %409 = arith.addf %408, %346 : vector<1x32xf32>
    %cst_158 = arith.constant 5.000000e-01 : f32
    %410 = vector.broadcast %cst_158 : f32 to vector<1x32xf32>
    %411 = arith.mulf %409, %410 : vector<1x32xf32>
    %cst_159 = arith.constant 1.41421354 : f32
    %412 = vector.broadcast %cst_159 : f32 to vector<1x32xf32>
    %413 = arith.divf %409, %412 : vector<1x32xf32>
    %414 = math.erf %413 : vector<1x32xf32>
    %cst_160 = arith.constant 1.000000e+00 : f32
    %415 = vector.broadcast %cst_160 : f32 to vector<1x32xf32>
    %416 = arith.addf %415, %414 : vector<1x32xf32>
    %417 = arith.mulf %411, %416 : vector<1x32xf32>
    %418 = arith.mulf %417, %347 : vector<1x32xf32>
    %cst_161 = arith.constant dense<0.000000e+00> : vector<1xf32>
    %419 = vector.multi_reduction <add>, %418, %cst_161 [1] : vector<1x32xf32> to vector<1xf32>
    %420 = vector.shape_cast %419 : vector<1xf32> to vector<1x1xf32>
    %421 = arith.addf %420, %348 : vector<1x1xf32>
    %422 = vector.extract_strided_slice %21 {offsets = [1, 0], sizes = [1, 8], strides = [1, 1]} : vector<2x8xf32> to vector<1x8xf32>
    %423 = vector.extract_strided_slice %332 {offsets = [1, 0], sizes = [1, 16], strides = [1, 1]} : vector<2x32xf32> to vector<1x16xf32>
    %424 = vector.extract_strided_slice %339 {offsets = [8, 0], sizes = [8, 16], strides = [1, 1]} : vector<16x32xf32> to vector<8x16xf32>
    %cst_162 = arith.constant dense<0.000000e+00> : vector<1x8xf32>
    %425 = tpu.matmul %423, %424, %cst_162 {dimension_numbers = #tpu.dot_dimension_numbers<[1], [1], [0], [0], [0, 0, 1, 0], [], []>} : vector<1x16xf32>, vector<8x16xf32>, vector<1x8xf32> -> vector<1x8xf32>
    %426 = vector.extract_strided_slice %332 {offsets = [1, 16], sizes = [1, 16], strides = [1, 1]} : vector<2x32xf32> to vector<1x16xf32>
    %427 = vector.extract_strided_slice %339 {offsets = [8, 16], sizes = [8, 16], strides = [1, 1]} : vector<16x32xf32> to vector<8x16xf32>
    %cst_163 = arith.constant dense<0.000000e+00> : vector<1x8xf32>
    %428 = tpu.matmul %426, %427, %cst_163 {dimension_numbers = #tpu.dot_dimension_numbers<[1], [1], [0], [0], [0, 0, 1, 0], [], []>} : vector<1x16xf32>, vector<8x16xf32>, vector<1x8xf32> -> vector<1x8xf32>
    %429 = tpu.concatenate %425, %428 in 0 : vector<1x8xf32>, vector<1x8xf32> -> vector<2x8xf32>
    %cst_164 = arith.constant 2.500000e-01 : f32
    %430 = vector.broadcast %cst_164 : f32 to vector<2x8xf32>
    %431 = arith.mulf %429, %430 : vector<2x8xf32>
    %cst_165 = arith.constant 5.000000e-01 : f32
    %432 = vector.broadcast %cst_165 : f32 to vector<1x8xf32>
    %433 = arith.cmpf ogt, %422, %432 : vector<1x8xf32>
    %cst_166 = arith.constant -1.000000e+30 : f32
    %434 = vector.shape_cast %433 : vector<1x8xi1> to vector<1x8xi1>
    %435 = vector.broadcast %434 : vector<1x8xi1> to vector<2x8xi1>
    %436 = vector.broadcast %cst_166 : f32 to vector<2x8xf32>
    %437 = arith.select %435, %436, %431 : vector<2x8xi1>, vector<2x8xf32>
    %cst_167 = arith.constant dense<0xFF800000> : vector<2xf32>
    %438 = vector.multi_reduction <maximumf>, %437, %cst_167 [1] : vector<2x8xf32> to vector<2xf32>
    %439 = vector.shape_cast %438 : vector<2xf32> to vector<2x1xf32>
    %440 = vector.broadcast %439 : vector<2x1xf32> to vector<2x8xf32>
    %441 = arith.subf %437, %440 : vector<2x8xf32>
    %442 = math.exp %441 : vector<2x8xf32>
    %cst_168 = arith.constant dense<0.000000e+00> : vector<2xf32>
    %443 = vector.multi_reduction <add>, %442, %cst_168 [1] : vector<2x8xf32> to vector<2xf32>
    %444 = vector.shape_cast %443 : vector<2xf32> to vector<2x1xf32>
    %445 = tpu.reciprocal %444 {approx = true} : vector<2x1xf32> -> vector<2x1xf32>
    %446 = vector.broadcast %445 : vector<2x1xf32> to vector<2x8xf32>
    %447 = arith.mulf %442, %446 : vector<2x8xf32>
    %448 = vector.extract_strided_slice %447 {offsets = [0, 0], sizes = [1, 8], strides = [1, 1]} : vector<2x8xf32> to vector<1x8xf32>
    %449 = vector.extract_strided_slice %343 {offsets = [8, 0], sizes = [8, 16], strides = [1, 1]} : vector<16x32xf32> to vector<8x16xf32>
    %cst_169 = arith.constant dense<0.000000e+00> : vector<1x16xf32>
    %450 = tpu.matmul %448, %449, %cst_169 {dimension_numbers = #tpu.dot_dimension_numbers<[1], [0], [0], [1], [0, 0, 1, 1], [], []>} : vector<1x8xf32>, vector<8x16xf32>, vector<1x16xf32> -> vector<1x16xf32>
    %451 = vector.extract_strided_slice %447 {offsets = [1, 0], sizes = [1, 8], strides = [1, 1]} : vector<2x8xf32> to vector<1x8xf32>
    %452 = vector.extract_strided_slice %343 {offsets = [8, 16], sizes = [8, 16], strides = [1, 1]} : vector<16x32xf32> to vector<8x16xf32>
    %cst_170 = arith.constant dense<0.000000e+00> : vector<1x16xf32>
    %453 = tpu.matmul %451, %452, %cst_170 {dimension_numbers = #tpu.dot_dimension_numbers<[1], [0], [0], [1], [0, 0, 1, 1], [], []>} : vector<1x8xf32>, vector<8x16xf32>, vector<1x16xf32> -> vector<1x16xf32>
    %454 = tpu.concatenate %450, %453 in 1 : vector<1x16xf32>, vector<1x16xf32> -> vector<1x32xf32>
    %455 = vector.extract_strided_slice %0 {offsets = [1, 0], sizes = [1, 32], strides = [1, 1]} : vector<2x32xf32> to vector<1x32xf32>
    %456 = vector.extract_strided_slice %327 {offsets = [8, 0], sizes = [1, 32], strides = [1, 1]} : vector<16x32xf32> to vector<1x32xf32>
    %457 = tpu.concatenate %454, %455, %456 in 1 : vector<1x32xf32>, vector<1x32xf32>, vector<1x32xf32> -> vector<1x96xf32>
    %cst_171 = arith.constant dense<0.000000e+00> : vector<1x32xf32>
    %458 = tpu.matmul %457, %344, %cst_171 {dimension_numbers = #tpu.dot_dimension_numbers<[1], [0], [0], [1], [0, 0, 1, 1], [], []>} : vector<1x96xf32>, vector<96x32xf32>, vector<1x32xf32> -> vector<1x32xf32>
    %c277_172 = arith.constant 277 : index
    %c0_173 = arith.constant 0 : index
    %459 = vector.load %arg6[%c277_172, %c0_173] : memref<296x32xf32, #tpu.memory_space<vmem>>, vector<1x32xf32>
    %460 = arith.addf %458, %459 : vector<1x32xf32>
    %cst_174 = arith.constant dense<0.000000e+00> : vector<1xf32>
    %461 = vector.multi_reduction <add>, %460, %cst_174 [1] : vector<1x32xf32> to vector<1xf32>
    %462 = vector.shape_cast %461 : vector<1xf32> to vector<1x1xf32>
    %cst_175 = arith.constant 3.200000e+01 : f32
    %463 = vector.broadcast %cst_175 : f32 to vector<1x1xf32>
    %464 = arith.divf %462, %463 : vector<1x1xf32>
    %465 = vector.broadcast %464 : vector<1x1xf32> to vector<1x32xf32>
    %466 = arith.subf %460, %465 : vector<1x32xf32>
    %467 = vector.broadcast %464 : vector<1x1xf32> to vector<1x32xf32>
    %468 = arith.subf %460, %467 : vector<1x32xf32>
    %469 = arith.mulf %466, %468 : vector<1x32xf32>
    %cst_176 = arith.constant dense<0.000000e+00> : vector<1xf32>
    %470 = vector.multi_reduction <add>, %469, %cst_176 [1] : vector<1x32xf32> to vector<1xf32>
    %471 = vector.shape_cast %470 : vector<1xf32> to vector<1x1xf32>
    %cst_177 = arith.constant 3.200000e+01 : f32
    %472 = vector.broadcast %cst_177 : f32 to vector<1x1xf32>
    %473 = arith.divf %471, %472 : vector<1x1xf32>
    %474 = vector.broadcast %464 : vector<1x1xf32> to vector<1x32xf32>
    %475 = arith.subf %460, %474 : vector<1x32xf32>
    %cst_178 = arith.constant 9.99999974E-6 : f32
    %476 = vector.broadcast %cst_178 : f32 to vector<1x1xf32>
    %477 = arith.addf %473, %476 : vector<1x1xf32>
    %478 = math.rsqrt %477 : vector<1x1xf32>
    %479 = vector.broadcast %478 : vector<1x1xf32> to vector<1x32xf32>
    %480 = arith.mulf %475, %479 : vector<1x32xf32>
    %481 = arith.mulf %480, %345 : vector<1x32xf32>
    %482 = arith.addf %481, %346 : vector<1x32xf32>
    %cst_179 = arith.constant 5.000000e-01 : f32
    %483 = vector.broadcast %cst_179 : f32 to vector<1x32xf32>
    %484 = arith.mulf %482, %483 : vector<1x32xf32>
    %cst_180 = arith.constant 1.41421354 : f32
    %485 = vector.broadcast %cst_180 : f32 to vector<1x32xf32>
    %486 = arith.divf %482, %485 : vector<1x32xf32>
    %487 = math.erf %486 : vector<1x32xf32>
    %cst_181 = arith.constant 1.000000e+00 : f32
    %488 = vector.broadcast %cst_181 : f32 to vector<1x32xf32>
    %489 = arith.addf %488, %487 : vector<1x32xf32>
    %490 = arith.mulf %484, %489 : vector<1x32xf32>
    %491 = arith.mulf %490, %347 : vector<1x32xf32>
    %cst_182 = arith.constant dense<0.000000e+00> : vector<1xf32>
    %492 = vector.multi_reduction <add>, %491, %cst_182 [1] : vector<1x32xf32> to vector<1xf32>
    %493 = vector.shape_cast %492 : vector<1xf32> to vector<1x1xf32>
    %494 = arith.addf %493, %348 : vector<1x1xf32>
    %495 = vector.extract_strided_slice %374 {offsets = [0, 0], sizes = [1, 8], strides = [1, 1]} : vector<2x8xf32> to vector<1x8xf32>
    %496 = vector.extract_strided_slice %447 {offsets = [0, 0], sizes = [1, 8], strides = [1, 1]} : vector<2x8xf32> to vector<1x8xf32>
    %497 = vector.extract_strided_slice %374 {offsets = [1, 0], sizes = [1, 8], strides = [1, 1]} : vector<2x8xf32> to vector<1x8xf32>
    %498 = vector.extract_strided_slice %447 {offsets = [1, 0], sizes = [1, 8], strides = [1, 1]} : vector<2x8xf32> to vector<1x8xf32>
    %499 = tpu.concatenate %495, %496, %497, %498 in 0 : vector<1x8xf32>, vector<1x8xf32>, vector<1x8xf32>, vector<1x8xf32> -> vector<4x8xf32>
    %c0_183 = arith.constant 0 : index
    %c0_184 = arith.constant 0 : index
    %500 = vector.load %arg8[%c0_183, %c0_184] : memref<4x8xf32, #tpu.memory_space<vmem>>, vector<4x8xf32>
    tpu.vector_store %arg8[%c0_183, %c0_184], %499 {strides = array<i32>} : memref<4x8xf32, #tpu.memory_space<vmem>>, vector<4x8xf32>,
    %501 = tpu.concatenate %421, %494 in 0 : vector<1x1xf32>, vector<1x1xf32> -> vector<2x1xf32>
    %c0_185 = arith.constant 0 : index
    %c0_186 = arith.constant 0 : index
    %502 = vector.load %arg9[%c0_185, %c0_186] : memref<2x1xf32, #tpu.memory_space<vmem>>, vector<2x1xf32>
    tpu.vector_store %arg9[%c0_185, %c0_186], %501 {strides = array<i32>} : memref<2x1xf32, #tpu.memory_space<vmem>>, vector<2x1xf32>,
    return
  }
  func.func @transform_0(%arg0: i32) -> (i32, i32) {
    %c0_i32 = arith.constant 0 : i32
    %c0_i32_0 = arith.constant 0 : i32
    %c0_i32_1 = arith.constant 0 : i32
    return %c0_i32, %c0_i32_0 : i32, i32
  }
  func.func @transform_1(%arg0: i32) -> (i32, i32) {
    %c0_i32 = arith.constant 0 : i32
    %c0_i32_0 = arith.constant 0 : i32
    %c0_i32_1 = arith.constant 0 : i32
    return %c0_i32, %c0_i32_0 : i32, i32
  }
  func.func @transform_2(%arg0: i32) -> (i32, i32) {
    %c0_i32 = arith.constant 0 : i32
    %c0_i32_0 = arith.constant 0 : i32
    %c0_i32_1 = arith.constant 0 : i32
    return %c0_i32, %c0_i32_0 : i32, i32
  }
  func.func @transform_3(%arg0: i32) -> (i32, i32) {
    %c0_i32 = arith.constant 0 : i32
    %c0_i32_0 = arith.constant 0 : i32
    %c0_i32_1 = arith.constant 0 : i32
    return %c0_i32, %c0_i32_0 : i32, i32
  }
  func.func @transform_4(%arg0: i32) -> (i32, i32) {
    %c0_i32 = arith.constant 0 : i32
    %c0_i32_0 = arith.constant 0 : i32
    %c0_i32_1 = arith.constant 0 : i32
    return %c0_i32, %c0_i32_0 : i32, i32
  }
  func.func @transform_5(%arg0: i32) -> (i32, i32) {
    %c0_i32 = arith.constant 0 : i32
    %c0_i32_0 = arith.constant 0 : i32
    %c0_i32_1 = arith.constant 0 : i32
    return %c0_i32, %c0_i32_0 : i32, i32
  }
  func.func @transform_6(%arg0: i32) -> (i32, i32, i32) {
    %c0_i32 = arith.constant 0 : i32
    %c0_i32_0 = arith.constant 0 : i32
    %c0_i32_1 = arith.constant 0 : i32
    %c0_i32_2 = arith.constant 0 : i32
    return %c0_i32, %c0_i32_0, %c0_i32_1 : i32, i32, i32
  }
  func.func @transform_7(%arg0: i32) -> (i32, i32) {
    %c0_i32 = arith.constant 0 : i32
    %c0_i32_0 = arith.constant 0 : i32
    %c0_i32_1 = arith.constant 0 : i32
    return %c0_i32, %c0_i32_0 : i32, i32
  }
  func.func @transform_8(%arg0: i32) -> (i32, i32) {
    %c0_i32 = arith.constant 0 : i32
    %c0_i32_0 = arith.constant 0 : i32
    %c0_i32_1 = arith.constant 0 : i32
    return %c0_i32, %c0_i32_0 : i32, i32
  }
}

</mosaic_0001>

<bundles_post_ra>
// kernel: gnn_forward.1
= control target key start
LH: loop header
LB: loop body
LE: loop exit
PB: predicated region body
PF: predicated region fallthrough
CT: control target
= control target key end

     0   :  { %v32_v0 = vlaneseq  ;;  %v3919_v4 = vmov 0   ;;  %vm72_vm0 = vcmask 97280   ;;  %s4584_s0 = inlined_call_operand.vmem [shape: f32[2,32], index: 0, kind: input, shape index: {}]   ;;  %s4585_s1 = inlined_call_operand.vmem [shape: s32[16,1], index: 1, kind: input, shape index: {}]   ;;  %s4586_s2 = inlined_call_operand.vmem [shape: s32[2,8], index: 2, kind: input, shape index: {}]   ;;  %s4587_s3 = inlined_call_operand.vmem [shape: s32[2,1], index: 3, kind: input, shape index: {}]   ;;  %s4588_s4 = inlined_call_operand.vmem [shape: s32[2,12], index: 4, kind: input, shape index: {}]   ;;  %s4589_s5 = inlined_call_operand.vmem [shape: f32[296,32], index: 5, kind: input, shape index: {}]   ;;  %s4590_s6 = inlined_call_operand.vmem [shape: f32[5,32,64], index: 6, kind: input, shape index: {}]   ;;  %s4591_s7 = inlined_call_operand.hbm [shape: f32[4,8], index: 7, kind: output, shape index: {0}]   ;;  %s4592_s8 = inlined_call_operand.vmem [shape: f32[2,1], index: 8, kind: output, shape index: {1}]  }
   0x1   :  { %v3110_v1 = vld [vmem:[%s4588_s4] ss:$0 sm:$0xff]  ;;  %v3111_v2 = vld [vmem:[%s4588_s4 + $0x1] ss:$0 sm:$0xff]  ;;  %3788 = vset.pattern.permute.xlu0 %v3919_v4  ;;  %v256_v6 = vld [vmem:[%s4585_s1 + $0x8] sm:$0xff] }
   0x2   :  { %v3984_v3 = vshrl.u32 %v32_v0, 7  ;;  %v255_v5 = vld [vmem:[%s4585_s1] sm:$0xff] }
   0x3   :  { %14 = vsyncpa [#allocation3], 0  ;;  %v3118_v8 = vadd.s32 4294967295, %v255_v5  ;;  %v3920_v9 = vmov 0.0   ;;  %v3119_v12 = vadd.s32 4294967295, %v256_v6  ;;  %v3921_v15 = vmov 0.0|0.0  }
   0x4   :  { %v3994_v7 = vadd.s32 8, %v3984_v3  ;;  %vm60_vm1 = vcmp.eq.s32.totalorder %v3984_v3, %v3110_v1  ;;  %vm68_vm2 = vcmp.eq.s32.totalorder %v3984_v3, %v3111_v2  ;;  %vm3621_vm4 = vmpackc.low %vm72_vm0, %vm72_vm0  ;;  %v166_v16 = vld [vmem:[%s4589_s5 + $0x30] sm:$0xff]  ;;  %v167_v17 = vld [vmem:[%s4589_s5 + $0x38] sm:$0xff]  ;;  %vm3922_vm6 = vmmov 0   ;;  %s3925_s13 = smov 32   ;;  %s3926_s4 = smov 112  }
   0x5   :  { %v62_v10 = vsel %vm60_vm1, 1.0, %v3920_v9  ;;  %v70_v11 = vsel %vm68_vm2, 1.0, %v3920_v9  ;;  %260 = vperm.xlu0 %3788, %v3118_v8   ;;  %v3627_v19 = vpack.c.bf16 %v167_v17, %v166_v16  ;;  %v168_v20 = vld [vmem:[%s4589_s5 + $0x40] sm:$0xff]  ;;  %v169_v21 = vld [vmem:[%s4589_s5 + $0x48] sm:$0xff]  ;;  %vm175_vm7 = vcmask 261120   ;;  %v271_v27 = vld [vmem:[%s4589_s5 + $0x10] sm:$0xff] }
   0x6   :  { %vm61_vm3 = vcmp.eq.s32.totalorder %v3994_v7, %v3110_v1  ;;  %3351 = vmatprep.mubr.msk.f32.mxu0 %vm72_vm0, %v70_v11  ;;  %vm69_vm5 = vcmp.eq.s32.totalorder %v3994_v7, %v3111_v2  ;;  %v3630_v22 = vpack.c.bf16 %v169_v21, %v168_v20  ;;  %v29_v23 = vld [vmem:[%s4584_s0] sm:$0x3]  ;;  %v270_v25 = vld [vmem:[%s4589_s5 + $0x8] sm:$0xff]  ;;  %v272_v28 = vld [vmem:[%s4589_s5 + $0x18] sm:$0xff]  ;;  %v4046_v33 = vand.u32 127, %v32_v0  ;;  %s3928_s19 = smov 96  }
   0x7   :  { %v63_v13 = vsel %vm61_vm3, 1.0, %v3920_v9  ;;  %v71_v18 = vsel %vm69_vm5, 1.0, %v3920_v9  ;;  %v269_v24 = vld [vmem:[%s4589_s5] sm:$0xff]  ;;  %v3636_v30 = vpack.c.bf16 %v272_v28, %v271_v27  ;;  %v274_v31 = vld [vmem:[%s4589_s5 + $0x28] sm:$0xff]  ;;  %vm371_vm13 = vcmask 15360   ;;  %v473_v61 = vld [vmem:[%s4590_s6 + $0x10] sm:$0xff] }
   0x8   :  { %v3620_v14 = vpack.c.bf16 %v63_v13, %v62_v10  ;;  %v3632_v26 = vpack.c.bf16 %v270_v25, %v269_v24  ;;  %v273_v29 = vld [vmem:[%s4589_s5 + $0x20] sm:$0xff]  ;;  %v357_v34 = vmul.u32 8, %v4046_v33  ;;  %vm275_vm1 = vcmask 392192   ;;  %v3116_v48 = vld [vmem:[%s4589_s5 + $0x110] ss:$0 sm:$0xff]  ;;  %v472_v55 = vld [vmem:[%s4590_s6 + $0x8] sm:$0xff] }
   0x9   :  { %263 = vperm.xlu0 %3788, %v3119_v12   ;;  %v3640_v32 = vpack.c.bf16 %v274_v31, %v273_v29  ;;  %v471_v54 = vld [vmem:[%s4590_s6] sm:$0xff]  ;;  %v474_v62 = vld [vmem:[%s4590_s6 + $0x18] sm:$0xff]  ;;  %v3923_v0 = vmov 32   ;;  %s3929_s20 = smov 64   ;;  %s3930_s21 = smov 16  }
   0xa   :  { %3622 = vmatprep.subr.msk.bf16.mxu0 %vm3621_vm4, %v3620_v14  ;;  %v360_v35 = vadd.s32 8, %v357_v34  ;;  %vm358_vm8 = vcmp.ge.s32.totalorder %v3984_v3, %v357_v34  ;;  %vm359_vm11 = vcmp.ge.s32.totalorder %v3994_v7, %v357_v34  ;;  %vm367_vm15 = vcmp.eq.s32.totalorder %v3984_v3, %v357_v34  ;;  %3790 = vset.pattern.permute.xlu1 %v3923_v0  ;;  %s3931_s26 = smov [#allocation2]  }
   0xb   :  { %3625 = vmatpush3.bf16.xpose.msk.msra.mxu0 %vm3621_vm4, %v3620_v14  ;;  %v369_v38 = vsel %vm367_vm15, 1.0, %v3920_v9  ;;  %vm384_vm4 = vcmask 1041408   ;;  %v3644_v59 = vpack.c.bf16 %v472_v55, %v471_v54  ;;  %v3648_v63 = vpack.c.bf16 %v474_v62, %v473_v61  ;;  %v3136_v54 = vld [vmem:[%s4590_s6 + $0x28] sm:$0xff]  ;;  %s3098_s27 = sshll.u32 %s3931_s26, 4  ;;  %s3099_s27 = int_to_ptr.vmem [resolvable:$true] %s3098_s27 }
   0xc   :  { %3626 = vmatprep.subr.bf16.mxu0 %v3921_v15  ;;  %vm361_vm9 = vcmp.lt.s32.totalorder %v3984_v3, %v360_v35  ;;  %vm362_vm12 = vcmp.lt.s32.totalorder %v3994_v7, %v360_v35  ;;  %v372_v41 = vsel %vm371_vm13, %v369_v38, -inf  ;;  %s3895_s28 = scalar_lea.vmem %s3099_s27, 64  ;;  %p3900_p1 = scmp.lt.s32.totalorder %s3099_s27, %s3099_s27 }
   0xd   :  { %vm363_vm10 = vmand %vm358_vm8, %vm361_vm9  ;;  %373 = vmax.xlane.f32.xlu1 %v372_v41  ;;  %3789 = vset.pattern.permute.xlu0 %v3923_v0  ;;  %p3896_p0 = scmp.ne.s32.totalorder %s3099_s27, %s3895_s28  ;;  %p3901_p2 = scmp.lt.s32.totalorder %s3895_s28, %s3895_s28 }
   0xe   :  { %v365_v36 = vsel %vm363_vm10, 1.0, %v3920_v9  ;;  %vm4055_vm14 = vmand %vm359_vm11, %vm362_vm12  ;;  %vm163_vm11 = vcmp.eq.s32.totalorder %v3994_v7, %v4046_v33 }
   0xf   :  { %3382 = vmatprep.mubr.msk.f32.mxu1 %vm371_vm13, %v365_v36  ;;  %v366_v60 = vsel %vm4055_vm14, 1.0, %v3920_v9  ;;  %vm4109_vm9 = vmpackc.low %vm175_vm7, %vm175_vm7  ;;  %p3902_p3 = por %p3901_p2, %p3900_p1 }
  0x11   :  { %p3903_p4 = pnand %p3902_p3, %p3896_p0 }
  0x12   :  { %3352 = vmatmul.mubr.msk.f32.vlgmr.msra.gmra.mrb[0].mxu0 %vm72_vm0, %v71_v18  ;;  %vm368_vm0 = vcmp.eq.s32.totalorder %v3994_v7, %v357_v34  ;;  %v556_v18 = vld [vmem:[%s4589_s5 + $0x11c] sm:$0x1] }
  0x13   :  { %3628 = vmatpush3.bf16.msra.mxu0 %v3627_v19  ;;  %3362 = vmatprep.mubr.msk.f32.mxu0 %vm3922_vm6, %v3920_v9  ;;  %v370_v39 = vsel %vm368_vm0, 1.0, %v3920_v9  ;;  %v4123_v19 = vsub.s32 0, %v3984_v3 }
  0x14   :  { %3629 = vmatprep.subr.bf16.mxu0 %v3921_v15  ;;  %v375_v43 = vsel %vm371_vm13, %v370_v39, -inf }
  0x15   :  { %376 = vmax.xlane.f32.xlu1 %v375_v43 }
  0x17   :  { %3631 = vmatpush3.bf16.msra.mxu0 %v3630_v22 }
  0x18   :  { %3633 = vmatprep.subr.bf16.mxu0 %v3632_v26 }
  0x1a   :  { %3363 = vmatmul.mubr.msk.f32.vlgmr.msra.gmra.mrb[2].mxu0 %vm175_vm7, %v29_v23 }
  0x1b   :  { %3635 = vmatpush3.bf16.msra.mxu0 %v3632_v26 }
  0x1c   :  { %3637 = vmatprep.subr.bf16.mxu0 %v3636_v30 }
  0x1f   :  { %3639 = vmatpush3.bf16.msra.mxu0 %v3636_v30  ;;  %v3181_v30 = vld [vmem:[%s4589_s5 + $0x121] ss:$0 sm:$0xff] }
  0x20   :  { %3641 = vmatprep.subr.bf16.mxu0 %v3640_v32 }
  0x23   :  { %3643 = vmatpush3.bf16.msra.mxu0 %v3640_v32 }
  0x24   :  { %3652 = vmatprep.subr.bf16.mxu0 %v3921_v15 }
  0x84   :  { %v261_v40 = vpop.permute.xlu0 %260 }
  0x85   :  { %vm265_vm2 = vcmp.eq.s32.totalorder %v4046_v33, %v261_v40 }
  0x86   :  { %v267_v42 = vsel %vm265_vm2, 1.0, %v3920_v9 }
  0x87   :  { %3377 = vmatprep.mubr.msk.f32.mxu0 %vm275_vm1, %v267_v42 }
  0x88   :  { %v264_v44 = vpop.permute.xlu0 %263 }
  0x89   :  { %vm266_vm3 = vcmp.eq.s32.totalorder %v4046_v33, %v264_v44 }
  0x8a   :  { %v268_v45 = vsel %vm266_vm3, 1.0, %v3920_v9 }
  0x8b   :  { %3378 = vmatmul.mubr.msk.f32.vlgmr.msra.gmra.mrb[4].mxu0 %vm275_vm1, %v268_v45  ;;  %vm658_vm1 = vcmask 130048  }
  0x8c   :  { %3400 = vmatprep.mubr.msk.f32.mxu0 %vm3922_vm6, %v3920_v9 }
  0x9a   :  { %v374_v5 = vpop.xlane.xlu1 %373 }
  0x9b   :  { %vm463_vm8 = vcmp.gt.f32.partialorder %v374_v5, 0.5 }
  0xa2   :  { %v377_v6 = vpop.xlane.xlu1 %376 }
  0xa3   :  { %vm464_vm5 = vcmp.gt.f32.partialorder %v377_v6, 0.5 }
  0xe5   :  { %v4072_v46 = vpop.f32.mrb[0].mxu0 }
  0xe6   :  { %v4074_v47 = vpop.f32.mrb[1].mxu0  ;;  %vm161_vm10 = vcmp.gt.f32.partialorder %v4072_v46, 0.0 }
  0xe7   :  { %vm160_vm12 = vcmp.gt.f32.partialorder %v4074_v47, 0.0  ;;  %vm4132_vm0 = vmor %vm161_vm10, %vm163_vm11 }
  0xed   :  { %v245_v49 = vpop.f32.mrb[2].mxu0 }
  0xee   :  { %v246_v50 = vadd.f32 %v3116_v48, %v245_v49  ;;  %v3364_v51 = vpop.f32.mrb[3].mxu0 }
  0xf0   :  { %v251_v52 = vmul.f32 0.70710677, %v246_v50  ;;  %v249_v56 = vmul.f32 0.5, %v246_v50 }
  0xf2   :  { %3798 = verf.f32 %v251_v52 }
  0xfc   :  { %v3799_v53 = vpop.eup %3798 }
  0xfd   :  { %v253_v57 = vadd.f32 1.0, %v3799_v53  ;;  %v3135_v53 = vld [vmem:[%s4590_s6 + $0x20] sm:$0xff] }
  0xfe   :  { %v3660_v55 = vpack.c.bf16 %v3136_v54, %v3135_v53 }
  0xff   :  { %v254_v58 = vmul.f32 %v253_v57, %v249_v56  ;;  %v3137_v56 = vld [vmem:[%s4590_s6 + $0x30] sm:$0xff]  ;;  %v3138_v57 = vld [vmem:[%s4590_s6 + $0x38] sm:$0xff] }
 0x101   :  { %3380 = vmatprep.subr.msk.mxu1 %vm384_vm4, %v254_v58 }
 0x102   :  { %3381 = vmatpush3.msk.msra.mxu1 %vm384_vm4, %v254_v58  ;;  %v3664_v58 = vpack.c.bf16 %v3138_v57, %v3137_v56 }
 0x103   :  { %3383 = vmatmul.mubr.msk.f32.vlgmr.msra.gmra.mrb[0].mxu1 %vm371_vm13, %v366_v60  ;;  %3645 = vmatprep.subr.bf16.mxu1 %v3644_v59  ;;  %vm162_vm13 = vcmp.eq.s32.totalorder %v3984_v3, %v4046_v33 }
 0x104   :  { %3647 = vmatpush3.bf16.msra.mxu1 %v3644_v59  ;;  %vm4136_vm2 = vmor %vm160_vm12, %vm162_vm13  ;;  %v3130_v59 = vld [vmem:[%s4589_s5 + $0x118] ss:$0 sm:$0xff] }
 0x105   :  { %3649 = vmatprep.subr.bf16.mxu1 %v3648_v63 }
 0x108   :  { %3651 = vmatpush3.bf16.msra.mxu1 %v3648_v63 }
 0x15e   :  { %v3379_v1 = vpop.f32.mrb[4].mxu0 }
 0x15f   :  { %v348_v2 = vpop.f32.mrb[5].mxu0 }
 0x1d6   :  { %v3384_v8 = vpop.f32.mrb[0].mxu1 }
 0x1d7   :  { %v4099_v10 = vsel %vm464_vm5, %v3384_v8, %v3379_v1  ;;  %v454_v11 = vpop.f32.mrb[1].mxu1 }
 0x1d8   :  { %v4101_v12 = vsel %vm463_vm8, %v454_v11, %v348_v2 }
 0x1d9   :  { %3393 = vmatprep.mubr.msk.f32.mxu1 %vm175_vm7, %v4101_v12 }
 0x1da   :  { %3394 = vmatmul.mubr.msk.f32.vlgmr.msra.gmra.mrb[2].mxu1 %vm175_vm7, %v4099_v10 }
 0x2ad   :  { %v3395_v13 = vpop.f32.mrb[2].mxu1 }
 0x2ae   :  { %641 = vperm.xlu1 %3790, %v3395_v13   ;;  %v547_v14 = vpop.f32.mrb[3].mxu1 }
 0x2af   :  { %v3653_v17 = vpack.c.bf16 %v3395_v13, %v547_v14  ;;  %637 = vperm.xlu0 %3789, %v547_v14  }
 0x2b1   :  { %3655 = vmatpush3.bf16.xpose.msk.msra.mxu0 %vm4109_vm9, %v3653_v17  ;;  %3657 = vmatprep.subr.bf16.mxu1 %v3653_v17 }
 0x2b2   :  { %3659 = vmatpush3.bf16.msra.mxu1 %v3653_v17  ;;  %3668 = vmatprep.subr.bf16.mxu0 %v3921_v15 }
 0x2b3   :  { %3661 = vmatprep.subr.bf16.mxu1 %v3660_v55 }
 0x2b8   :  { %3401 = vmatmul.mubr.msk.f32.vlgmr.msra.gmra.mrb[6].mxu0 %vm175_vm7, %v556_v18 }
 0x2b9   :  { %3425 = vmatprep.mubr.msk.f32.mxu0 %vm3922_vm6, %v3920_v9 }
 0x32d   :  { %v642_v23 = vpop.permute.xlu1 %641 }
 0x32e   :  { %v638_v24 = vpop.permute.xlu0 %637 }
 0x38b   :  { %v632_v20 = vpop.f32.mrb[6].mxu0 }
 0x38c   :  { %v647_v21 = vrot.slane %v632_v20, %v4123_v19  ;;  %v3402_v22 = vpop.f32.mrb[7].mxu0 }
 0x38e   :  { %v648_v25 = vadd.f32 %v647_v21, %v638_v24  ;;  %v649_v26 = vadd.f32 %v647_v21, %v642_v23  ;;  %v865_v23 = vld [vmem:[%s4589_s5 + $0x11d] sm:$0x1] }
 0x390   :  { %vm651_vm14 = vcmp.gt.f32.partialorder %v649_v26, 0.0  ;;  %v653_v27 = vmul.f32 0.2, %v649_v26  ;;  %vm650_vm15 = vcmp.gt.f32.partialorder %v648_v25, 0.0  ;;  %v652_v28 = vmul.f32 0.2, %v648_v25 }
 0x392   :  { %v655_v7 = vsel %vm651_vm14, %v649_v26, %v653_v27  ;;  %v654_v31 = vsel %vm650_vm15, %v648_v25, %v652_v28 }
 0x393   :  { %v657_v32 = vsel %vm4132_vm0, %v655_v7, -1e+30  ;;  %v656_v34 = vsel %vm4136_vm2, %v654_v31, -1e+30 }
 0x394   :  { %v662_v35 = vsel %vm658_vm1, %v657_v32, -inf  ;;  %v659_v36 = vsel %vm658_vm1, %v656_v34, -inf }
 0x395   :  { %663 = vmax.xlane.f32.xlu1 %v662_v35  ;;  %660 = vmax.xlane.f32.xlu0 %v659_v36  ;;  %v3149_v35 = vld [vmem:[%s4589_s5 + $0x120] ss:$0 sm:$0xff] }
 0x422   :  { %v664_v37 = vpop.xlane.xlu1 %663  ;;  %v661_v38 = vpop.xlane.xlu0 %660 }
 0x423   :  { %v666_v39 = vsub.f32 %v657_v32, %v664_v37  ;;  %v665_v40 = vsub.f32 %v656_v34, %v661_v38 }
 0x425   :  { %v667_v41 = vmul.f32 1.442695, %v665_v40  ;;  %v669_v42 = vmul.f32 1.442695, %v666_v39 }
 0x427   :  { %3800 = vpow2.f32 %v667_v41 }
 0x428   :  { %3802 = vpow2.f32 %v669_v42 }
 0x431   :  { %v3801_v43 = vpop.eup %3800 }
 0x432   :  { %v671_v44 = vsel %vm658_vm1, %v3801_v43, 0.0  ;;  %v3803_v45 = vpop.eup %3802 }
 0x433   :  { %672 = vadd.xlane.f32.xlu0 %v671_v44  ;;  %v674_v46 = vsel %vm658_vm1, %v3803_v45, 0.0 }
 0x437   :  { %675 = vadd.xlane.f32.xlu0 %v674_v46 }
 0x4c0   :  { %v673_v47 = vpop.xlane.xlu0 %672 }
 0x4c1   :  { %3804 = vrcp.f32 %v673_v47 }
 0x4c4   :  { %v676_v48 = vpop.xlane.xlu0 %675 }
 0x4c5   :  { %3806 = vrcp.f32 %v676_v48 }
 0x4cb   :  { %v3805_v49 = vpop.eup %3804 }
 0x4cc   :  { %v679_v50 = vmul.f32 %v3805_v49, %v3801_v43 }
 0x4ce   :  { %3407 = vmatprep.mubr.msk.f32.mxu1 %vm658_vm1, %v679_v50 }
 0x4cf   :  { %v3807_v51 = vpop.eup %3806 }
 0x4d0   :  { %v680_v52 = vmul.f32 %v3807_v51, %v3803_v45 }
 0x4d2   :  { %3408 = vmatmul.mubr.msk.f32.vlgmr.msra.gmra.mrb[4].mxu1 %vm658_vm1, %v680_v52 }
 0x4d3   :  { %3663 = vmatpush3.bf16.msra.mxu1 %v3660_v55 }
 0x4d4   :  { %3665 = vmatprep.subr.bf16.mxu1 %v3664_v58 }
 0x4d7   :  { %3667 = vmatpush3.bf16.msra.mxu1 %v3664_v58 }
 0x5a5   :  { %v3409_v60 = vpop.f32.mrb[4].mxu1 }
 0x5a6   :  { %v764_v61 = vadd.f32 %v3409_v60, %v3130_v59  ;;  %v758_v62 = vpop.f32.mrb[5].mxu1 }
 0x5a7   :  { %v759_v63 = vadd.f32 %v3130_v59, %v758_v62  ;;  %v3144_v62 = vld [vmem:[%s4589_s5 + $0x119] ss:$0 sm:$0xff] }
 0x5a8   :  { %v770_v1 = vmin.f32 %v764_v61, 0.0  ;;  %vm768_vm5 = vcmp.gt.f32.partialorder %v764_v61, 0.0 }
 0x5a9   :  { %v769_v2 = vmin.f32 %v759_v63, 0.0  ;;  %vm767_vm3 = vcmp.gt.f32.partialorder %v759_v63, 0.0 }
 0x5aa   :  { %v773_v5 = vmul.f32 1.442695, %v770_v1 }
 0x5ab   :  { %v771_v6 = vmul.f32 1.442695, %v769_v2 }
 0x5ac   :  { %3808 = vpow2.f32 %v773_v5 }
 0x5ad   :  { %3810 = vpow2.f32 %v771_v6 }
 0x5b6   :  { %v3809_v8 = vpop.eup %3808 }
 0x5b7   :  { %v3811_v11 = vpop.eup %3810  ;;  %v3134_v13 = vadd.f32 -1.0, %v3809_v8 }
 0x5b8   :  { %v3133_v14 = vadd.f32 -1.0, %v3811_v11 }
 0x5b9   :  { %v4167_v18 = vsel %vm768_vm5, %v764_v61, %v3134_v13 }
 0x5ba   :  { %v4165_v17 = vsel %vm767_vm3, %v759_v63, %v3133_v14  ;;  %v1095_v44 = vmul.f32 %v3149_v35, %v4167_v18 }
 0x5bb   :  { %3418 = vmatprep.mubr.msk.f32.mxu1 %vm175_vm7, %v4165_v17  ;;  %v1094_v42 = vmul.f32 %v3149_v35, %v4165_v17 }
 0x5bc   :  { %3419 = vmatmul.mubr.msk.f32.vlgmr.msra.gmra.mrb[6].mxu1 %vm175_vm7, %v4167_v18  ;;  %v1099_v45 = vsel %vm175_vm7, %v1095_v44, 0.0 }
 0x5bd   :  { %v1096_v43 = vsel %vm175_vm7, %v1094_v42, 0.0 }
 0x68f   :  { %v3420_v20 = vpop.f32.mrb[6].mxu1 }
 0x690   :  { %950 = vperm.xlu1 %3790, %v3420_v20   ;;  %v856_v21 = vpop.f32.mrb[7].mxu1 }
 0x691   :  { %v3669_v22 = vpack.c.bf16 %v3420_v20, %v856_v21  ;;  %946 = vperm.xlu0 %3789, %v856_v21  }
 0x693   :  { %3671 = vmatpush3.bf16.xpose.msk.msra.mxu0 %vm4109_vm9, %v3669_v22  ;;  %3673 = vmatprep.subr.bf16.mxu1 %v3669_v22 }
 0x694   :  { %3675 = vmatpush3.bf16.msra.mxu1 %v3669_v22  ;;  %3791 = vset.pattern.permute.xlu1 %v3919_v4 }
 0x695   :  { %3792 = vset.pattern.permute.xlu0 %v3919_v4  ;;  %3684 = vmatprep.subr.bf16.mxu1 %v3921_v15 }
 0x69a   :  { %3426 = vmatmul.mubr.msk.f32.vlgmr.msra.gmra.mrb[8].mxu0 %vm175_vm7, %v865_v23  ;;  %v3150_v23 = vld [vmem:[%s4589_s5 + $0x122] ss:$0 sm:$0xff] }
 0x70f   :  { %v951_v27 = vpop.permute.xlu1 %950 }
 0x710   :  { %v947_v28 = vpop.permute.xlu0 %946 }
 0x76d   :  { %v941_v24 = vpop.f32.mrb[8].mxu0 }
 0x76e   :  { %v956_v25 = vrot.slane %v941_v24, %v4123_v19  ;;  %v3427_v26 = vpop.f32.mrb[9].mxu0 }
 0x770   :  { %v957_v7 = vadd.f32 %v956_v25, %v947_v28  ;;  %v958_v31 = vadd.f32 %v956_v25, %v951_v27 }
 0x772   :  { %vm960_vm8 = vcmp.gt.f32.partialorder %v958_v31, 0.0  ;;  %v962_v32 = vmul.f32 0.2, %v958_v31  ;;  %vm959_vm10 = vcmp.gt.f32.partialorder %v957_v7, 0.0  ;;  %v961_v34 = vmul.f32 0.2, %v957_v7 }
 0x774   :  { %v964_v36 = vsel %vm960_vm8, %v958_v31, %v962_v32  ;;  %v963_v37 = vsel %vm959_vm10, %v957_v7, %v961_v34  ;;  %v4213_v31 = vld [vmem:[%s4589_s5 + $0x125] ss:$0 sm:$0xff]  ;;  %vm1891_vm8 = vcmask 523264  }
 0x775   :  { %v966_v38 = vsel %vm4132_vm0, %v964_v36, -1e+30  ;;  %v965_v39 = vsel %vm4136_vm2, %v963_v37, -1e+30 }
 0x776   :  { %v970_v40 = vsel %vm658_vm1, %v966_v38, -inf  ;;  %v967_v41 = vsel %vm658_vm1, %v965_v39, -inf }
 0x777   :  { %971 = vmax.xlane.f32.xlu1 %v970_v40  ;;  %968 = vmax.xlane.f32.xlu0 %v967_v41 }
 0x77b   :  { %1097 = vadd.xlane.f32.xlu1 %v1096_v43 }
 0x77f   :  { %1100 = vadd.xlane.f32.xlu1 %v1099_v45 }
 0x804   :  { %v972_v46 = vpop.xlane.xlu1 %971  ;;  %v969_v47 = vpop.xlane.xlu0 %968 }
 0x805   :  { %v974_v48 = vsub.f32 %v966_v38, %v972_v46  ;;  %v973_v49 = vsub.f32 %v965_v39, %v969_v47 }
 0x807   :  { %v975_v50 = vmul.f32 1.442695, %v973_v49  ;;  %v977_v51 = vmul.f32 1.442695, %v974_v48 }
 0x808   :  { %v1098_v32 = vpop.xlane.xlu1 %1097 }
 0x809   :  { %3812 = vpow2.f32 %v975_v50 }
 0x80a   :  { %3814 = vpow2.f32 %v977_v51  ;;  %v3153_v51 = vld [vmem:[%s4590_s6 + $0x40] sm:$0xff] }
 0x80c   :  { %v1101_v37 = vpop.xlane.xlu1 %1100 }
 0x813   :  { %v3813_v52 = vpop.eup %3812 }
 0x814   :  { %v979_v53 = vsel %vm658_vm1, %v3813_v52, 0.0  ;;  %v3815_v54 = vpop.eup %3814 }
 0x815   :  { %980 = vadd.xlane.f32.xlu0 %v979_v53  ;;  %v982_v55 = vsel %vm658_vm1, %v3815_v54, 0.0 }
 0x819   :  { %983 = vadd.xlane.f32.xlu0 %v982_v55  ;;  %v3156_v55 = vld [vmem:[%s4590_s6 + $0x58] sm:$0xff] }
 0x8a2   :  { %v981_v56 = vpop.xlane.xlu0 %980 }
 0x8a3   :  { %3816 = vrcp.f32 %v981_v56 }
 0x8a6   :  { %v984_v57 = vpop.xlane.xlu0 %983 }
 0x8a7   :  { %3818 = vrcp.f32 %v984_v57 }
 0x8ad   :  { %v3817_v58 = vpop.eup %3816 }
 0x8ae   :  { %v987_v59 = vmul.f32 %v3817_v58, %v3813_v52  ;;  %v3154_v52 = vld [vmem:[%s4590_s6 + $0x48] sm:$0xff] }
 0x8af   :  { %v3676_v53 = vpack.c.bf16 %v3154_v52, %v3153_v51 }
 0x8b0   :  { %3432 = vmatprep.mubr.msk.f32.mxu1 %vm658_vm1, %v987_v59 }
 0x8b1   :  { %v3819_v60 = vpop.eup %3818  ;;  %3677 = vmatprep.subr.bf16.mxu0 %v3676_v53 }
 0x8b2   :  { %v988_v61 = vmul.f32 %v3819_v60, %v3815_v54  ;;  %3679 = vmatpush3.bf16.msra.mxu0 %v3676_v53  ;;  %v3155_v54 = vld [vmem:[%s4590_s6 + $0x50] sm:$0xff] }
 0x8b4   :  { %3433 = vmatmul.mubr.msk.f32.vlgmr.msra.gmra.mrb[8].mxu1 %vm658_vm1, %v988_v61 }
 0x8b5   :  { %3450 = vmatprep.mubr.msk.f32.mxu1 %vm3922_vm6, %v3920_v9 }
 0x987   :  { %v3434_v63 = vpop.f32.mrb[8].mxu1 }
 0x988   :  { %v1072_v1 = vadd.f32 %v3434_v63, %v3144_v62  ;;  %v1066_v2 = vpop.f32.mrb[9].mxu1 }
 0x989   :  { %v1067_v5 = vadd.f32 %v3144_v62, %v1066_v2 }
 0x98a   :  { %v1078_v6 = vmin.f32 %v1072_v1, 0.0  ;;  %vm1076_vm11 = vcmp.gt.f32.partialorder %v1072_v1, 0.0 }
 0x98b   :  { %v1077_v8 = vmin.f32 %v1067_v5, 0.0  ;;  %vm1075_vm12 = vcmp.gt.f32.partialorder %v1067_v5, 0.0 }
 0x98c   :  { %v1081_v11 = vmul.f32 1.442695, %v1078_v6 }
 0x98d   :  { %v1079_v13 = vmul.f32 1.442695, %v1077_v8 }
 0x98e   :  { %3820 = vpow2.f32 %v1081_v11 }
 0x98f   :  { %3822 = vpow2.f32 %v1079_v13 }
 0x998   :  { %v3821_v14 = vpop.eup %3820 }
 0x999   :  { %v3823_v20 = vpop.eup %3822  ;;  %v3148_v21 = vadd.f32 -1.0, %v3821_v14 }
 0x99a   :  { %v3147_v22 = vadd.f32 -1.0, %v3823_v20 }
 0x99b   :  { %v1086_v25 = vsel %vm1076_vm11, %v1072_v1, %v3148_v21 }
 0x99c   :  { %v1085_v24 = vsel %vm1075_vm12, %v1067_v5, %v3147_v22  ;;  %v1107_v28 = vmul.f32 %v3150_v23, %v1086_v25  ;;  %vm41_vm12 = vcmask 58368  }
 0x99d   :  { %v1106_v26 = vmul.f32 %v3150_v23, %v1085_v24 }
 0x99e   :  { %v1111_v7 = vsel %vm175_vm7, %v1107_v28, 0.0 }
 0x99f   :  { %v1108_v27 = vsel %vm175_vm7, %v1106_v26, 0.0 }
 0x9a0   :  { %1109 = vadd.xlane.f32.xlu0 %v1108_v27 }
 0x9a4   :  { %1112 = vadd.xlane.f32.xlu0 %v1111_v7 }
 0xa2d   :  { %v1110_v34 = vpop.xlane.xlu0 %1109 }
 0xa2e   :  { %v1114_v35 = vadd.f32 %v1110_v34, %v1098_v32 }
 0xa30   :  { %v1120_v36 = vadd.f32 %v4213_v31, %v1114_v35 }
 0xa31   :  { %v1113_v38 = vpop.xlane.xlu0 %1112 }
 0xa32   :  { %v3151_v39 = vmul.f32 -1.442695, %v1120_v36  ;;  %v1115_v40 = vadd.f32 %v1113_v38, %v1101_v37 }
 0xa34   :  { %3824 = vpow2.f32 %v3151_v39  ;;  %v1121_v41 = vadd.f32 %v4213_v31, %v1115_v40 }
 0xa36   :  { %v3152_v42 = vmul.f32 -1.442695, %v1121_v41 }
 0xa38   :  { %3826 = vpow2.f32 %v3152_v42 }
 0xa3e   :  { %v3825_v43 = vpop.eup %3824 }
 0xa3f   :  { %v1128_v44 = vadd.f32 1.0, %v3825_v43 }
 0xa41   :  { %3828 = vrcp.f32 %v1128_v44 }
 0xa42   :  { %v3827_v45 = vpop.eup %3826 }
 0xa43   :  { %v1129_v46 = vadd.f32 1.0, %v3827_v45 }
 0xa45   :  { %3830 = vrcp.f32 %v1129_v46 }
 0xa4b   :  { %v3829_v47 = vpop.eup %3828 }
 0xa4c   :  { %1136 = vperm.xlu1 %3791, %v3829_v47   ;;  %v1146_v48 = vsub.f32 1.0, %v3829_v47 }
 0xa4e   :  { %1150 = vperm.xlu0 %3792, %v1146_v48  }
 0xa4f   :  { %v3831_v49 = vpop.eup %3830 }
 0xa50   :  { %1141 = vperm.xlu1 %3791, %v3831_v49   ;;  %v1147_v50 = vsub.f32 1.0, %v3831_v49 }
 0xa52   :  { %3794 = vset.pattern.permute.xlu0 %v3923_v0 }
 0xa54   :  { %1155 = vperm.xlu1 %3791, %v1147_v50  }
 0xa58   :  { %3793 = vset.pattern.permute.xlu1 %v3923_v0  ;;  %v3680_v0 = vpack.c.bf16 %v3156_v55, %v3155_v54 }
 0xa5a   :  { %3681 = vmatprep.subr.bf16.mxu0 %v3680_v0 }
 0xa5b   :  { %3683 = vmatpush3.bf16.msra.mxu0 %v3680_v0 }
 0xacb   :  { %v1137_v56 = vpop.permute.xlu1 %1136 }
 0xacc   :  { %v1144_v58 = vmul.f32 %v1137_v56, %v4165_v17 }
 0xacd   :  { %v1151_v57 = vpop.permute.xlu0 %1150 }
 0xace   :  { %v1158_v59 = vmul.f32 %v1151_v57, %v1085_v24 }
 0xacf   :  { %v1142_v60 = vpop.permute.xlu1 %1141 }
 0xad0   :  { %v1160_v61 = vadd.f32 %v1158_v59, %v1144_v58  ;;  %v1145_v1 = vmul.f32 %v1142_v60, %v4167_v18  ;;  %v1258_v18 = vld [vmem:[%s4589_s5 + $0x11e] sm:$0x1]  ;;  %v3167_v59 = vld [vmem:[%s4590_s6 + $0x60] sm:$0xff]  ;;  %v3168_v60 = vld [vmem:[%s4590_s6 + $0x68] sm:$0xff] }
 0xad2   :  { %v1164_v62 = vmul.f32 0.70710677, %v1160_v61  ;;  %v1162_v11 = vmul.f32 0.5, %v1160_v61  ;;  %v3692_v61 = vpack.c.bf16 %v3168_v60, %v3167_v59 }
 0xad3   :  { %v1156_v63 = vpop.permute.xlu1 %1155 }
 0xad4   :  { %3832 = verf.f32 %v1164_v62  ;;  %v1159_v2 = vmul.f32 %v1156_v63, %v1086_v25  ;;  %v3169_v62 = vld [vmem:[%s4590_s6 + $0x70] sm:$0xff]  ;;  %v3170_v63 = vld [vmem:[%s4590_s6 + $0x78] sm:$0xff] }
 0xad6   :  { %v1161_v5 = vadd.f32 %v1159_v2, %v1145_v1  ;;  %v3696_v1 = vpack.c.bf16 %v3170_v63, %v3169_v62  ;;  %v3162_v2 = vld [vmem:[%s4589_s5 + $0x11a] ss:$0 sm:$0xff] }
 0xad8   :  { %v1165_v6 = vmul.f32 0.70710677, %v1161_v5  ;;  %v1163_v17 = vmul.f32 0.5, %v1161_v5 }
 0xada   :  { %3834 = verf.f32 %v1165_v6 }
 0xade   :  { %v3833_v8 = vpop.eup %3832 }
 0xadf   :  { %v1168_v13 = vadd.f32 1.0, %v3833_v8 }
 0xae1   :  { %v1170_v14 = vmul.f32 %v1168_v13, %v1162_v11 }
 0xae3   :  { %3443 = vmatprep.mubr.msk.f32.mxu0 %vm175_vm7, %v1170_v14 }
 0xae4   :  { %v3835_v20 = vpop.eup %3834 }
 0xae5   :  { %v1169_v21 = vadd.f32 1.0, %v3835_v20 }
 0xae7   :  { %v1171_v22 = vmul.f32 %v1169_v21, %v1163_v17 }
 0xae9   :  { %3444 = vmatmul.mubr.msk.f32.vlgmr.msra.gmra.mrb[10].mxu0 %vm175_vm7, %v1171_v22 }
 0xbbc   :  { %v3445_v23 = vpop.f32.mrb[10].mxu0 }
 0xbbd   :  { %v1249_v24 = vpop.f32.mrb[11].mxu0 }
 0xbbe   :  { %v3685_v26 = vpack.c.bf16 %v3445_v23, %v1249_v24  ;;  %1339 = vperm.xlu1 %3793, %v1249_v24  }
 0xbc0   :  { %3687 = vmatpush3.bf16.xpose.msk.msra.mxu1 %vm4109_vm9, %v3685_v26  ;;  %3689 = vmatprep.subr.bf16.mxu0 %v3685_v26 }
 0xbc1   :  { %3691 = vmatpush3.bf16.msra.mxu0 %v3685_v26  ;;  %3693 = vmatprep.subr.bf16.mxu1 %v3692_v61 }
 0xbc2   :  { %1343 = vperm.xlu1 %3793, %v3445_v23   ;;  %3700 = vmatprep.subr.bf16.mxu0 %v3921_v15 }
 0xbc7   :  { %3451 = vmatmul.mubr.msk.f32.vlgmr.msra.gmra.mrb[10].mxu1 %vm175_vm7, %v1258_v18 }
 0xbc8   :  { %3695 = vmatpush3.bf16.msra.mxu1 %v3692_v61 }
 0xbc9   :  { %3697 = vmatprep.subr.bf16.mxu1 %v3696_v1 }
 0xbcc   :  { %3699 = vmatpush3.bf16.msra.mxu1 %v3696_v1 }
 0xc3d   :  { %v1340_v25 = vpop.permute.xlu1 %1339 }
 0xc41   :  { %v1344_v32 = vpop.permute.xlu1 %1343 }
 0xc9a   :  { %v1334_v27 = vpop.f32.mrb[10].mxu1 }
 0xc9b   :  { %v1349_v28 = vrot.slane %v1334_v27, %v4123_v19  ;;  %v3452_v7 = vpop.f32.mrb[11].mxu1 }
 0xc9c   :  { %v1566_v7 = vld [vmem:[%s4589_s5 + $0x11f] sm:$0x1] }
 0xc9d   :  { %v1350_v34 = vadd.f32 %v1349_v28, %v1340_v25  ;;  %v1351_v35 = vadd.f32 %v1349_v28, %v1344_v32 }
 0xc9f   :  { %vm1353_vm13 = vcmp.gt.f32.partialorder %v1351_v35, 0.0  ;;  %v1355_v36 = vmul.f32 0.2, %v1351_v35  ;;  %vm1352_vm14 = vcmp.gt.f32.partialorder %v1350_v34, 0.0  ;;  %v1354_v37 = vmul.f32 0.2, %v1350_v34 }
 0xca1   :  { %v1357_v38 = vsel %vm1353_vm13, %v1351_v35, %v1355_v36  ;;  %v1356_v39 = vsel %vm1352_vm14, %v1350_v34, %v1354_v37  ;;  %vm45_vm14 = vcmp.eq.s32.totalorder %v4046_v33, 0 }
 0xca2   :  { %v1359_v40 = vsel %vm4132_vm0, %v1357_v38, -1e+30  ;;  %v1358_v41 = vsel %vm4136_vm2, %v1356_v39, -1e+30 }
 0xca3   :  { %v1363_v42 = vsel %vm658_vm1, %v1359_v40, -inf  ;;  %v1360_v43 = vsel %vm658_vm1, %v1358_v41, -inf }
 0xca4   :  { %1364 = vmax.xlane.f32.xlu0 %v1363_v42  ;;  %1361 = vmax.xlane.f32.xlu1 %v1360_v43 }
 0xd31   :  { %v1365_v44 = vpop.xlane.xlu0 %1364  ;;  %v1362_v45 = vpop.xlane.xlu1 %1361 }
 0xd32   :  { %v1367_v46 = vsub.f32 %v1359_v40, %v1365_v44  ;;  %v1366_v47 = vsub.f32 %v1358_v41, %v1362_v45 }
 0xd34   :  { %v1368_v48 = vmul.f32 1.442695, %v1366_v47  ;;  %v1370_v49 = vmul.f32 1.442695, %v1367_v46 }
 0xd36   :  { %3836 = vpow2.f32 %v1368_v48 }
 0xd37   :  { %3838 = vpow2.f32 %v1370_v49 }
 0xd40   :  { %v3837_v50 = vpop.eup %3836 }
 0xd41   :  { %v1372_v51 = vsel %vm658_vm1, %v3837_v50, 0.0  ;;  %v3839_v52 = vpop.eup %3838 }
 0xd42   :  { %1373 = vadd.xlane.f32.xlu1 %v1372_v51  ;;  %v1375_v53 = vsel %vm658_vm1, %v3839_v52, 0.0 }
 0xd46   :  { %1376 = vadd.xlane.f32.xlu1 %v1375_v53 }
 0xdcf   :  { %v1374_v54 = vpop.xlane.xlu1 %1373 }
 0xdd0   :  { %3840 = vrcp.f32 %v1374_v54 }
 0xdd3   :  { %v1377_v55 = vpop.xlane.xlu1 %1376 }
 0xdd4   :  { %3842 = vrcp.f32 %v1377_v55 }
 0xdda   :  { %v3841_v0 = vpop.eup %3840 }
 0xddb   :  { %v1380_v56 = vmul.f32 %v3841_v0, %v3837_v50 }
 0xddd   :  { %3457 = vmatprep.mubr.msk.f32.mxu0 %vm658_vm1, %v1380_v56 }
 0xdde   :  { %v3843_v57 = vpop.eup %3842 }
 0xddf   :  { %v1381_v58 = vmul.f32 %v3843_v57, %v3839_v52 }
 0xde1   :  { %3458 = vmatmul.mubr.msk.f32.vlgmr.msra.gmra.mrb[12].mxu0 %vm658_vm1, %v1381_v58 }
 0xde2   :  { %3475 = vmatprep.mubr.msk.f32.mxu0 %vm3922_vm6, %v3920_v9 }
 0xeb4   :  { %v3459_v5 = vpop.f32.mrb[12].mxu0 }
 0xeb5   :  { %v1465_v6 = vadd.f32 %v3459_v5, %v3162_v2  ;;  %v1459_v8 = vpop.f32.mrb[13].mxu0 }
 0xeb6   :  { %v1460_v11 = vadd.f32 %v3162_v2, %v1459_v8  ;;  %v3176_v2 = vld [vmem:[%s4589_s5 + $0x11b] ss:$0 sm:$0xff] }
 0xeb7   :  { %v1471_v13 = vmin.f32 %v1465_v6, 0.0  ;;  %vm1469_vm3 = vcmp.gt.f32.partialorder %v1465_v6, 0.0 }
 0xeb8   :  { %v1470_v14 = vmin.f32 %v1460_v11, 0.0  ;;  %vm1468_vm15 = vcmp.gt.f32.partialorder %v1460_v11, 0.0 }
 0xeb9   :  { %v1474_v20 = vmul.f32 1.442695, %v1471_v13 }
 0xeba   :  { %v1472_v17 = vmul.f32 1.442695, %v1470_v14 }
 0xebb   :  { %3844 = vpow2.f32 %v1474_v20 }
 0xebc   :  { %3846 = vpow2.f32 %v1472_v17 }
 0xec5   :  { %v3845_v21 = vpop.eup %3844 }
 0xec6   :  { %v3847_v22 = vpop.eup %3846  ;;  %v3166_v23 = vadd.f32 -1.0, %v3845_v21 }
 0xec7   :  { %v3165_v24 = vadd.f32 -1.0, %v3847_v22 }
 0xec8   :  { %v4272_v18 = vsel %vm1469_vm3, %v1465_v6, %v3166_v23 }
 0xec9   :  { %v4270_v26 = vsel %vm1468_vm15, %v1460_v11, %v3165_v24  ;;  %v1795_v57 = vmul.f32 %v3181_v30, %v4272_v18 }
 0xeca   :  { %3468 = vmatprep.mubr.msk.f32.mxu1 %vm175_vm7, %v4270_v26  ;;  %v1794_v0 = vmul.f32 %v3181_v30, %v4270_v26 }
 0xecb   :  { %3469 = vmatmul.mubr.msk.f32.vlgmr.msra.gmra.mrb[12].mxu1 %vm175_vm7, %v4272_v18  ;;  %v1799_v58 = vsel %vm175_vm7, %v1795_v57, 0.0  ;;  %v1883_v57 = vld [vmem:[%s4589_s5 + $0x98] sm:$0xff] }
 0xecc   :  { %v1796_v56 = vsel %vm175_vm7, %v1794_v0, 0.0 }
 0xf9e   :  { %v3470_v25 = vpop.f32.mrb[12].mxu1 }
 0xf9f   :  { %1651 = vperm.xlu1 %3793, %v3470_v25   ;;  %v1557_v27 = vpop.f32.mrb[13].mxu1 }
 0xfa0   :  { %v3701_v28 = vpack.c.bf16 %v3470_v25, %v1557_v27  ;;  %1647 = vperm.xlu0 %3794, %v1557_v27   ;;  %v3182_v25 = vld [vmem:[%s4589_s5 + $0x123] ss:$0 sm:$0xff] }
 0xfa2   :  { %3703 = vmatpush3.bf16.xpose.msk.msra.mxu0 %vm4109_vm9, %v3701_v28  ;;  %3705 = vmatprep.subr.bf16.mxu1 %v3701_v28 }
 0xfa3   :  { %3707 = vmatpush3.bf16.msra.mxu1 %v3701_v28 }
 0xfa4   :  { %3724 = vmatprep.subr.bf16.mxu1 %v3921_v15 }
 0xfa9   :  { %3476 = vmatmul.mubr.msk.f32.vlgmr.msra.gmra.mrb[14].mxu0 %vm175_vm7, %v1566_v7 }
0x101e   :  { %v1652_v36 = vpop.permute.xlu1 %1651 }
0x101f   :  { %v1648_v37 = vpop.permute.xlu0 %1647 }
0x107c   :  { %v1642_v32 = vpop.f32.mrb[14].mxu0 }
0x107d   :  { %v1657_v34 = vrot.slane %v1642_v32, %v4123_v19  ;;  %v3477_v35 = vpop.f32.mrb[15].mxu0 }
0x107f   :  { %v1658_v38 = vadd.f32 %v1657_v34, %v1648_v37  ;;  %v1659_v39 = vadd.f32 %v1657_v34, %v1652_v36  ;;  %v3924_v36 = vmov 1  }
0x1080   :  { %3795 = vset.pattern.permute.xlu0 %v3924_v36  ;;  %3796 = vset.pattern.permute.xlu1 %v3924_v36  ;;  %v1984_v36 = vld [vmem:[%s4589_s5 + $0x58] sm:$0xff] }
0x1081   :  { %vm1661_vm5 = vcmp.gt.f32.partialorder %v1659_v39, 0.0  ;;  %v1663_v16 = vmul.f32 0.2, %v1659_v39  ;;  %vm1660_vm9 = vcmp.gt.f32.partialorder %v1658_v38, 0.0  ;;  %v1662_v40 = vmul.f32 0.2, %v1658_v38 }
0x1083   :  { %v1665_v41 = vsel %vm1661_vm5, %v1659_v39, %v1663_v16  ;;  %v1664_v42 = vsel %vm1660_vm9, %v1658_v38, %v1662_v40  ;;  %vm2338_vm9 = vcmask 1040384  }
0x1084   :  { %v1667_v43 = vsel %vm4132_vm0, %v1665_v41, -1e+30  ;;  %v1666_v44 = vsel %vm4136_vm2, %v1664_v42, -1e+30 }
0x1085   :  { %v1671_v45 = vsel %vm658_vm1, %v1667_v43, -inf  ;;  %v1668_v46 = vsel %vm658_vm1, %v1666_v44, -inf }
0x1086   :  { %1672 = vmax.xlane.f32.xlu0 %v1671_v45  ;;  %1669 = vmax.xlane.f32.xlu1 %v1668_v46 }
0x1113   :  { %v1673_v47 = vpop.xlane.xlu0 %1672  ;;  %v1670_v48 = vpop.xlane.xlu1 %1669 }
0x1114   :  { %v1675_v49 = vsub.f32 %v1667_v43, %v1673_v47  ;;  %v1674_v50 = vsub.f32 %v1666_v44, %v1670_v48 }
0x1116   :  { %v1676_v51 = vmul.f32 1.442695, %v1674_v50  ;;  %v1678_v52 = vmul.f32 1.442695, %v1675_v49 }
0x1118   :  { %3848 = vpow2.f32 %v1676_v51 }
0x1119   :  { %3850 = vpow2.f32 %v1678_v52 }
0x1122   :  { %v3849_v53 = vpop.eup %3848 }
0x1123   :  { %v1680_v29 = vsel %vm658_vm1, %v3849_v53, 0.0  ;;  %v3851_v54 = vpop.eup %3850 }
0x1124   :  { %1681 = vadd.xlane.f32.xlu1 %v1680_v29  ;;  %v1683_v55 = vsel %vm658_vm1, %v3851_v54, 0.0  ;;  %v1879_v29 = vld [vmem:[%s4589_s5 + $0x78] sm:$0xff] }
0x1128   :  { %1684 = vadd.xlane.f32.xlu1 %v1683_v55  ;;  %v1881_v55 = vld [vmem:[%s4589_s5 + $0x88] sm:$0xff] }
0x112c   :  { %1797 = vadd.xlane.f32.xlu1 %v1796_v56  ;;  %v1882_v56 = vld [vmem:[%s4589_s5 + $0x90] sm:$0xff] }
0x1130   :  { %1800 = vadd.xlane.f32.xlu1 %v1799_v58  ;;  %v3716_v58 = vpack.c.bf16 %v1883_v57, %v1882_v56 }
0x11b1   :  { %v1682_v59 = vpop.xlane.xlu1 %1681 }
0x11b2   :  { %3852 = vrcp.f32 %v1682_v59 }
0x11b5   :  { %v1685_v60 = vpop.xlane.xlu1 %1684 }
0x11b6   :  { %3854 = vrcp.f32 %v1685_v60 }
0x11b9   :  { %v1798_v37 = vpop.xlane.xlu1 %1797 }
0x11bc   :  { %v3853_v61 = vpop.eup %3852 }
0x11bd   :  { %v1688_v62 = vmul.f32 %v3853_v61, %v3849_v53  ;;  %v1801_v38 = vpop.xlane.xlu1 %1800 }
0x11bf   :  { %3482 = vmatprep.mubr.msk.f32.mxu1 %vm658_vm1, %v1688_v62 }
0x11c0   :  { %v3855_v63 = vpop.eup %3854 }
0x11c1   :  { %v1689_v1 = vmul.f32 %v3855_v63, %v3851_v54  ;;  %v1880_v54 = vld [vmem:[%s4589_s5 + $0x80] sm:$0xff] }
0x11c2   :  { %v3712_v0 = vpack.c.bf16 %v1881_v55, %v1880_v54 }
0x11c3   :  { %3483 = vmatmul.mubr.msk.f32.vlgmr.msra.gmra.mrb[14].mxu1 %vm658_vm1, %v1689_v1 }
0x11c4   :  { %3512 = vmatprep.mubr.msk.f32.mxu1 %vm3922_vm6, %v3920_v9 }
0x1296   :  { %v3484_v5 = vpop.f32.mrb[14].mxu1 }
0x1297   :  { %v1773_v6 = vadd.f32 %v3484_v5, %v3176_v2  ;;  %v1767_v8 = vpop.f32.mrb[15].mxu1 }
0x1298   :  { %v1768_v11 = vadd.f32 %v3176_v2, %v1767_v8 }
0x1299   :  { %v1779_v13 = vmin.f32 %v1773_v6, 0.0  ;;  %vm1777_vm0 = vcmp.gt.f32.partialorder %v1773_v6, 0.0 }
0x129a   :  { %v1778_v14 = vmin.f32 %v1768_v11, 0.0  ;;  %vm1776_vm2 = vcmp.gt.f32.partialorder %v1768_v11, 0.0 }
0x129b   :  { %v1782_v20 = vmul.f32 1.442695, %v1779_v13  ;;  %v1884_v13 = vld [vmem:[%s4589_s5 + $0xa0] sm:$0xff] }
0x129c   :  { %v1780_v17 = vmul.f32 1.442695, %v1778_v14  ;;  %v1885_v14 = vld [vmem:[%s4589_s5 + $0xa8] sm:$0xff] }
0x129d   :  { %3856 = vpow2.f32 %v1782_v20  ;;  %v3720_v20 = vpack.c.bf16 %v1885_v14, %v1884_v13 }
0x129e   :  { %3858 = vpow2.f32 %v1780_v17 }
0x12a7   :  { %v3857_v21 = vpop.eup %3856 }
0x12a8   :  { %v3859_v22 = vpop.eup %3858  ;;  %v3180_v23 = vadd.f32 -1.0, %v3857_v21 }
0x12a9   :  { %v3179_v24 = vadd.f32 -1.0, %v3859_v22 }
0x12aa   :  { %v1787_v28 = vsel %vm1777_vm0, %v1773_v6, %v3180_v23 }
0x12ab   :  { %v1786_v27 = vsel %vm1776_vm2, %v1768_v11, %v3179_v24  ;;  %v1807_v34 = vmul.f32 %v3182_v25, %v1787_v28  ;;  %vm2364_vm2 = vcmask 64512  }
0x12ac   :  { %v1806_v7 = vmul.f32 %v3182_v25, %v1786_v27 }
0x12ad   :  { %v1811_v35 = vsel %vm175_vm7, %v1807_v34, 0.0 }
0x12ae   :  { %v1808_v32 = vsel %vm175_vm7, %v1806_v7, 0.0 }
0x12af   :  { %1809 = vadd.xlane.f32.xlu1 %v1808_v32 }
0x12b3   :  { %1812 = vadd.xlane.f32.xlu1 %v1811_v35  ;;  %v1983_v35 = vld [vmem:[%s4589_s5 + $0x50] sm:$0xff] }
0x133c   :  { %v1810_v39 = vpop.xlane.xlu1 %1809 }
0x133d   :  { %v1814_v16 = vadd.f32 %v1810_v39, %v1798_v37  ;;  %v1986_v37 = vld [vmem:[%s4589_s5 + $0x68] sm:$0xff]  ;;  %v3190_v39 = vld [vmem:[%s4590_s6 + $0x80] sm:$0xff] }
0x133f   :  { %v1816_v40 = vadd.f32 %v4213_v31, %v1814_v16  ;;  %v3191_v16 = vld [vmem:[%s4590_s6 + $0x88] sm:$0xff] }
0x1340   :  { %v1813_v41 = vpop.xlane.xlu1 %1812 }
0x1341   :  { %v3183_v42 = vmul.f32 -1.442695, %v1816_v40  ;;  %v1815_v43 = vadd.f32 %v1813_v41, %v1801_v38  ;;  %v3730_v40 = vpack.c.bf16 %v3191_v16, %v3190_v39  ;;  %v4375_v41 = vld [vmem:[%s4584_s0] sm:$0x3] }
0x1343   :  { %3860 = vpow2.f32 %v3183_v42  ;;  %v1817_v44 = vadd.f32 %v4213_v31, %v1815_v43  ;;  %v1878_v31 = vld [vmem:[%s4589_s5 + $0x70] sm:$0xff]  ;;  %v3193_v43 = vld [vmem:[%s4590_s6 + $0x98] sm:$0xff] }
0x1344   :  { %v3708_v30 = vpack.c.bf16 %v1879_v29, %v1878_v31  ;;  %v3192_v42 = vld [vmem:[%s4590_s6 + $0x90] sm:$0xff] }
0x1345   :  { %v3184_v45 = vmul.f32 -1.442695, %v1817_v44  ;;  %v3734_v44 = vpack.c.bf16 %v3193_v43, %v3192_v42 }
0x1346   :  { %3709 = vmatprep.subr.bf16.mxu0 %v3708_v30 }
0x1347   :  { %3862 = vpow2.f32 %v3184_v45  ;;  %3711 = vmatpush3.bf16.msra.mxu0 %v3708_v30  ;;  %v3185_v45 = vld [vmem:[%s4589_s5 + $0x111] ss:$0 sm:$0xff] }
0x1348   :  { %3713 = vmatprep.subr.bf16.mxu0 %v3712_v0 }
0x134b   :  { %3715 = vmatpush3.bf16.msra.mxu0 %v3712_v0 }
0x134c   :  { %3717 = vmatprep.subr.bf16.mxu0 %v3716_v58 }
0x134d   :  { %v3861_v46 = vpop.eup %3860 }
0x134e   :  { %v1824_v47 = vadd.f32 1.0, %v3861_v46 }
0x134f   :  { %3719 = vmatpush3.bf16.msra.mxu0 %v3716_v58  ;;  %v3196_v58 = vld [vmem:[%s4589_s5 + $0x113] ss:$0 sm:$0xff] }
0x1350   :  { %3864 = vrcp.f32 %v1824_v47  ;;  %3721 = vmatprep.subr.bf16.mxu0 %v3720_v20 }
0x1351   :  { %v3863_v48 = vpop.eup %3862 }
0x1352   :  { %v1825_v49 = vadd.f32 1.0, %v3863_v48 }
0x1353   :  { %3723 = vmatpush3.bf16.msra.mxu0 %v3720_v20  ;;  %v3197_v20 = vld [vmem:[%s4589_s5 + $0x114] ss:$0 sm:$0xff] }
0x1354   :  { %3866 = vrcp.f32 %v1825_v49  ;;  %3526 = vmatprep.subr.mxu0 %v3920_v9 }
0x135a   :  { %v3865_v50 = vpop.eup %3864 }
0x135b   :  { %1832 = vperm.xlu0 %3795, %v3865_v50   ;;  %v1842_v52 = vsub.f32 1.0, %v3865_v50 }
0x135e   :  { %v3867_v51 = vpop.eup %3866 }
0x135f   :  { %1837 = vperm.xlu1 %3796, %v3867_v51   ;;  %v1843_v53 = vsub.f32 1.0, %v3867_v51 }
0x1363   :  { %1846 = vperm.xlu1 %3796, %v1842_v52  }
0x1367   :  { %1851 = vperm.xlu1 %3796, %v1843_v53  }
0x136b   :  { %3797 = vset.pattern.permute.xlu1 %v3919_v4 }
0x13da   :  { %v1833_v60 = vpop.permute.xlu0 %1832 }
0x13db   :  { %v1840_v62 = vmul.f32 %v1833_v60, %v4270_v26 }
0x13de   :  { %v1838_v59 = vpop.permute.xlu1 %1837 }
0x13df   :  { %v1841_v5 = vmul.f32 %v1838_v59, %v4272_v18 }
0x13e2   :  { %v1847_v61 = vpop.permute.xlu1 %1846 }
0x13e3   :  { %v1854_v63 = vmul.f32 %v1847_v61, %v1786_v27 }
0x13e5   :  { %v1856_v1 = vadd.f32 %v1854_v63, %v1840_v62  ;;  %v3188_v62 = vld [vmem:[%s4589_s5 + $0x112] ss:$0 sm:$0xff] }
0x13e6   :  { %v1852_v2 = vpop.permute.xlu1 %1851 }
0x13e7   :  { %v1860_v6 = vmul.f32 0.70710677, %v1856_v1  ;;  %v1855_v8 = vmul.f32 %v1852_v2, %v1787_v28  ;;  %v1858_v18 = vmul.f32 0.5, %v1856_v1  ;;  %v31_v2 = vld [vmem:[%s4587_s3] sm:$0x3] }
0x13e9   :  { %3868 = verf.f32 %v1860_v6  ;;  %v1857_v11 = vadd.f32 %v1855_v8, %v1841_v5  ;;  %v30_v8 = vld [vmem:[%s4586_s2] sm:$0x3]  ;;  %s3927_s2 = smov 80  }
0x13ea   :  { %vm38_vm10 = vcmp.eq.s32.totalorder %v30_v8, 3 }
0x13eb   :  { %v1861_v17 = vmul.f32 0.70710677, %v1857_v11  ;;  %v1859_v24 = vmul.f32 0.5, %v1857_v11 }
0x13ed   :  { %3870 = verf.f32 %v1861_v17 }
0x13f3   :  { %v3869_v26 = vpop.eup %3868 }
0x13f4   :  { %v1864_v21 = vadd.f32 1.0, %v3869_v26 }
0x13f6   :  { %v1866_v22 = vmul.f32 %v1864_v21, %v1858_v18 }
0x13f7   :  { %v3871_v23 = vpop.eup %3870 }
0x13f8   :  { %1870 = vrot.lane.b32.xlu1 %v1866_v22, %s3925_s13  ;;  %v1865_v25 = vadd.f32 1.0, %v3871_v23 }
0x13fa   :  { %v1867_v27 = vmul.f32 %v1865_v25, %v1859_v24 }
0x13fc   :  { %1872 = vrot.lane.b32.xlu1 %v1867_v27, %s3925_s13 }
0x146a   :  { %v1871_v28 = vpop.permute.xlu1 %1870 }
0x146b   :  { %v1876_v7 = vsel %vm175_vm7, %v4101_v12, %v1871_v28  ;;  %v3725_v12 = vpack.c.bf16 %v1984_v36, %v1983_v35 }
0x146c   :  { %3501 = vmatprep.mubr.msk.f32.mxu0 %vm1891_vm8, %v1876_v7 }
0x146d   :  { %3726 = vmatpush3.bf16.msra.mxu1 %v3725_v12 }
0x146e   :  { %v1873_v32 = vpop.permute.xlu1 %1872  ;;  %3727 = vmatprep.subr.bf16.mxu1 %v3921_v15 }
0x146f   :  { %v1877_v34 = vsel %vm175_vm7, %v4099_v10, %v1873_v32  ;;  %v1985_v10 = vld [vmem:[%s4589_s5 + $0x60] sm:$0xff] }
0x1470   :  { %3502 = vmatmul.mubr.msk.f32.vlgmr.msra.gmra.mrb[16].mxu0 %vm1891_vm8, %v1877_v34  ;;  %v3728_v38 = vpack.c.bf16 %v1986_v37, %v1985_v10 }
0x1471   :  { %3528 = vmatprep.mubr.msk.f32.mxu0 %vm3922_vm6, %v3920_v9 }
0x1472   :  { %3729 = vmatpush3.bf16.msra.mxu1 %v3728_v38 }
0x1473   :  { %3731 = vmatprep.subr.bf16.mxu1 %v3730_v40 }
0x1475   :  { %3513 = vmatmul.mubr.msk.f32.vlgmr.msra.gmra.mrb[16].mxu1 %vm175_vm7, %v4375_v41 }
0x1476   :  { %3733 = vmatpush3.bf16.msra.mxu1 %v3730_v40 }
0x1477   :  { %3735 = vmatprep.subr.bf16.mxu1 %v3734_v44 }
0x147a   :  { %3737 = vmatpush3.bf16.msra.mxu1 %v3734_v44 }
0x147b   :  { %3531 = vmatprep.subr.mxu1 %v3920_v9 }
0x1543   :  { %v3503_v46 = vpop.f32.mrb[16].mxu0 }
0x1544   :  { %v1970_v47 = vadd.f32 %v3503_v46, %v3185_v45  ;;  %v1964_v48 = vpop.f32.mrb[17].mxu0 }
0x1545   :  { %v1965_v49 = vadd.f32 %v3185_v45, %v1964_v48 }
0x1546   :  { %v1976_v50 = vmul.f32 0.70710677, %v1970_v47  ;;  %v1974_v30 = vmul.f32 0.5, %v1970_v47 }
0x1547   :  { %v1975_v51 = vmul.f32 0.70710677, %v1965_v49  ;;  %v1973_v29 = vmul.f32 0.5, %v1965_v49 }
0x1548   :  { %3872 = verf.f32 %v1976_v50  ;;  %v2058_v56 = vpop.f32.mrb[16].mxu1  ;;  %v2790_v50 = vsub.s32 1, %v3984_v3 }
0x1549   :  { %3874 = verf.f32 %v1975_v51  ;;  %v3514_v57 = vpop.f32.mrb[17].mxu1  ;;  %v4408_v1 = vadd.f32 %v3188_v62, %v2058_v56 }
0x154a   :  { %v2963_v57 = vrot.slane %v4375_v41, 1 }
0x154b   :  { %v2629_v17 = vrot.slane %v4408_v1, 1 }
0x1552   :  { %v3873_v52 = vpop.eup %3872 }
0x1553   :  { %v3875_v53 = vpop.eup %3874  ;;  %v1980_v31 = vadd.f32 1.0, %v3873_v52 }
0x1554   :  { %v1979_v54 = vadd.f32 1.0, %v3875_v53 }
0x1555   :  { %v4391_v0 = vmul.f32 %v1980_v31, %v1974_v30 }
0x1556   :  { %v4389_v55 = vmul.f32 %v1979_v54, %v1973_v29 }
0x1558   :  { %3523 = vmatprep.mubr.msk.f32.mxu1 %vm175_vm7, %v4389_v55 }
0x1559   :  { %3524 = vmatmul.mubr.msk.f32.vlgmr.msra.gmra.mrb[18].mxu1 %vm175_vm7, %v4391_v0 }
0x155a   :  { %3533 = vmatprep.mubr.msk.f32.mxu1 %vm3922_vm6, %v3920_v9 }
0x162c   :  { %v3525_v59 = vpop.f32.mrb[18].mxu1 }
0x162d   :  { %v4402_v60 = vadd.f32 %v3525_v59, %v3196_v58  ;;  %v2139_v61 = vpop.f32.mrb[19].mxu1 }
0x162e   :  { %v2153_v63 = vadd.f32 %v3196_v58, %v2139_v61 }
0x1630   :  { %2259 = vrot.lane.b32.xlu1 %v2153_v63, %s3926_s4  ;;  %3527 = vmatpush3.xpose.msk.msra.mxu0 %vm658_vm1, %v2153_v63 }
0x1631   :  { %3536 = vmatprep.subr.mxu0 %v3920_v9 }
0x1633   :  { %3529 = vmatmul.mubr.msk.f32.vlgmr.msra.gmra.mrb[18].mxu0 %vm658_vm1, %v4408_v1 }
0x1634   :  { %2257 = vrot.lane.b32.xlu1 %v4408_v1, %s3926_s4  ;;  %3538 = vmatprep.mubr.msk.f32.mxu0 %vm3922_vm6, %v3920_v9 }
0x1638   :  { %35 = vperm.xlu1 %3797, %v31_v2  }
0x16a2   :  { %v2260_v5 = vpop.permute.xlu1 %2259 }
0x16a3   :  { %3532 = vmatpush3.xpose.msk.msra.mxu1 %vm658_vm1, %v2260_v5 }
0x16a4   :  { %3541 = vmatprep.subr.mxu1 %v3920_v9 }
0x16a6   :  { %v2258_v6 = vpop.permute.xlu1 %2257 }
0x16a7   :  { %3534 = vmatmul.mubr.msk.f32.vlgmr.msra.gmra.mrb[20].mxu1 %vm658_vm1, %v2258_v6 }
0x16a8   :  { %3543 = vmatprep.mubr.msk.f32.mxu1 %vm3922_vm6, %v3920_v9 }
0x16b7   :  { %v36_v11 = vpop.permute.xlu1 %35 }
0x16b8   :  { %vm37_vm11 = vcmp.ge.s32.totalorder %v4046_v33, %v36_v11 }
0x16b9   :  { %vm39_vm13 = vmor %vm37_vm11, %vm38_vm10  ;;  %vm3078_vm11 = vcmask 1042432  }
0x16ba   :  { %v40_v13 = vsel %vm39_vm13, 1.0, %v3920_v9 }
0x16bb   :  { %v42_v14 = vsel %vm41_vm12, %v40_v13, inf }
0x16bc   :  { %43 = vmin.xlane.f32.xlu0 %v42_v14 }
0x16d2   :  { %2161 = vrot.lane.b32.xlu0 %v3197_v20, %s3925_s13 }
0x16d6   :  { %2707 = vrot.lane.b32.xlu0 %v4402_v60, %s3926_s4 }
0x16da   :  { %2705 = vrot.lane.b32.xlu0 %v2629_v17, %s3926_s4 }
0x1706   :  { %v2253_v26 = vpop.f32.mrb[18].mxu0 }
0x1707   :  { %v3530_v18 = vpop.f32.mrb[19].mxu0 }
0x1708   :  { %v2166_v18 = vld [vmem:[%s4589_s5 + $0xb0] sm:$0xff] }
0x1749   :  { %v44_v21 = vpop.xlane.xlu0 %43 }
0x174a   :  { %vm46_vm15 = vcmp.gt.f32.partialorder %v44_v21, 0.5  ;;  %v2167_v21 = vld [vmem:[%s4589_s5 + $0xb8] sm:$0xff] }
0x174b   :  { %vm49_vm3 = vmand %vm45_vm14, %vm46_vm15 }
0x174c   :  { %v50_v24 = vsel %vm49_vm3, 0.0, %v40_v13 }
0x174d   :  { %v2162_v22 = vpop.permute.xlu0 %2161  ;;  %vm2341_vm5 = vcmp.gt.f32.partialorder %v50_v24, 0.5 }
0x174e   :  { %v4436_v23 = vadd.f32 %v3525_v59, %v2162_v22  ;;  %v2342_v25 = vsel %vm2341_vm5, 1, %v3919_v4  ;;  %v2164_v39 = vadd.f32 %v2162_v22, %v2139_v61  ;;  %v2168_v22 = vld [vmem:[%s4589_s5 + $0xc0] sm:$0xff] }
0x174f   :  { %v2346_v32 = vrot.slane %v2342_v25, %v4123_v19  ;;  %v2791_v31 = vrot.slane %v2342_v25, %v2790_v50  ;;  %v2170_v25 = vld [vmem:[%s4589_s5 + $0xd0] sm:$0xff] }
0x1750   :  { %v2527_v50 = vld [vmem:[%s4589_s5 + $0x115] sm:$0x1] }
0x1751   :  { %vm2347_vm0 = vcmp.eq.s32.totalorder %v2346_v32, 1  ;;  %v2708_v44 = vpop.permute.xlu0 %2707  ;;  %vm2792_vm10 = vcmp.eq.s32.totalorder %v2791_v31, 1  ;;  %v2173_v32 = vld [vmem:[%s4589_s5 + $0xe8] sm:$0xff] }
0x1755   :  { %v2706_v45 = vpop.permute.xlu0 %2705 }
0x177a   :  { %v2331_v27 = vpop.f32.mrb[20].mxu1 }
0x177b   :  { %v2336_v28 = vrot.slane %v2331_v27, 7  ;;  %v3535_v7 = vpop.f32.mrb[21].mxu1  ;;  %v2171_v27 = vld [vmem:[%s4589_s5 + $0xd8] sm:$0xff] }
0x177c   :  { %v2172_v7 = vld [vmem:[%s4589_s5 + $0xe0] sm:$0xff] }
0x177d   :  { %v2339_v34 = vsel %vm2338_vm9, %v2253_v26, %v2336_v28  ;;  %v3745_v28 = vpack.c.bf16 %v2171_v27, %v2170_v25 }
0x177e   :  { %v2340_v35 = vmul.f32 0.25, %v2339_v34  ;;  %v3748_v34 = vpack.c.bf16 %v2173_v32, %v2172_v7  ;;  %v2180_v32 = vld [vmem:[%s4589_s5 + $0x124] sm:$0x1] }
0x1780   :  { %v2348_v36 = vsel %vm2347_vm0, -1e+30, %v2340_v35  ;;  %v2174_v35 = vld [vmem:[%s4589_s5 + $0xf0] sm:$0xff] }
0x1781   :  { %v2349_v12 = vsel %vm41_vm12, %v2348_v36, -inf }
0x1782   :  { %2350 = vmax.xlane.f32.xlu1 %v2349_v12 }
0x180f   :  { %v2351_v33 = vpop.xlane.xlu1 %2350 }
0x1810   :  { %v2352_v10 = vsub.f32 %v2348_v36, %v2351_v33  ;;  %v2175_v36 = vld [vmem:[%s4589_s5 + $0xf8] sm:$0xff]  ;;  %v2176_v33 = vld [vmem:[%s4589_s5 + $0x100] sm:$0xff] }
0x1811   :  { %v3751_v12 = vpack.c.bf16 %v2175_v36, %v2174_v35 }
0x1812   :  { %v2353_v37 = vmul.f32 1.442695, %v2352_v10  ;;  %v2177_v10 = vld [vmem:[%s4589_s5 + $0x108] sm:$0xff] }
0x1814   :  { %3876 = vpow2.f32 %v2353_v37  ;;  %v3754_v37 = vpack.c.bf16 %v2177_v10, %v2176_v33 }
0x181e   :  { %v3877_v38 = vpop.eup %3876 }
0x181f   :  { %v2355_v4 = vsel %vm41_vm12, %v3877_v38, 0.0 }
0x1820   :  { %2356 = vadd.xlane.f32.xlu1 %v2355_v4 }
0x1831   :  { %2439 = vrot.lane.b32.xlu1 %v2164_v39, %s3927_s2 }
0x18ad   :  { %v2357_v19 = vpop.xlane.xlu1 %2356 }
0x18ae   :  { %3878 = vrcp.f32 %v2357_v19 }
0x18b1   :  { %v2440_v16 = vpop.permute.xlu1 %2439 }
0x18b2   :  { %3542 = vmatpush3.msra.mxu1 %v2440_v16 }
0x18b3   :  { %3573 = vmatprep.subr.mxu1 %v3920_v9 }
0x18b8   :  { %v3879_v40 = vpop.eup %3878 }
0x18b9   :  { %v4446_v42 = vmul.f32 %v3879_v40, %v3877_v38 }
0x18bb   :  { %v2438_v43 = vrot.slane %v4446_v42, 1  ;;  %v3072_v6 = vrot.slane %v4446_v42, 7 }
0x18bd   :  { %3544 = vmatmul.mubr.msk.f32.vlgmr.msra.gmra.mrb[22].mxu1 %vm2364_vm2, %v2438_v43 }
0x18be   :  { %3574 = vmatpush3.xpose.msk.msra.mxu1 %vm658_vm1, %v4402_v60  ;;  %3575 = vmatprep.mubr.msk.f32.mxu1 %vm3922_vm6, %v3920_v9 }
0x18bf   :  { %3578 = vmatprep.subr.mxu1 %v3920_v9 }
0x18c1   :  { %3576 = vmatmul.mubr.msk.f32.vlgmr.msra.gmra.mrb[24].mxu1 %vm658_vm1, %v2629_v17 }
0x18c2   :  { %3579 = vmatpush3.xpose.msk.msra.mxu1 %vm658_vm1, %v2708_v44  ;;  %3580 = vmatprep.mubr.msk.f32.mxu1 %vm3922_vm6, %v3920_v9 }
0x18c3   :  { %3583 = vmatprep.subr.mxu1 %v3920_v9 }
0x18c5   :  { %3581 = vmatmul.mubr.msk.f32.vlgmr.msra.gmra.mrb[26].mxu1 %vm658_vm1, %v2706_v45 }
0x18c6   :  { %3585 = vmatprep.mubr.msk.f32.mxu1 %vm3922_vm6, %v3920_v9 }
0x1990   :  { %v2510_v46 = vpop.f32.mrb[22].mxu1 }
0x1991   :  { %v3545_v47 = vpop.f32.mrb[23].mxu1 }
0x1994   :  { %v2701_v48 = vpop.f32.mrb[24].mxu1 }
0x1995   :  { %v3577_v49 = vpop.f32.mrb[25].mxu1 }
0x1998   :  { %v2779_v51 = vpop.f32.mrb[26].mxu1 }
0x1999   :  { %v2784_v52 = vrot.slane %v2779_v51, 7  ;;  %v3582_v53 = vpop.f32.mrb[27].mxu1 }
0x199b   :  { %v2786_v29 = vsel %vm2338_vm9, %v2701_v48, %v2784_v52 }
0x199c   :  { %v2787_v54 = vmul.f32 0.25, %v2786_v29 }
0x199e   :  { %v2793_v30 = vsel %vm2792_vm10, -1e+30, %v2787_v54 }
0x199f   :  { %v2794_v56 = vsel %vm41_vm12, %v2793_v30, -inf }
0x19a0   :  { %2795 = vmax.xlane.f32.xlu1 %v2794_v56 }
0x19b1   :  { %2883 = vrot.lane.b32.xlu1 %v4436_v23, %s3927_s2 }
0x19b5   :  { %2361 = vrot.lane.b32.xlu1 %v2164_v39, %s3928_s19 }
0x19b9   :  { %2964 = vrot.lane.b32.xlu1 %v2963_v57, %s3925_s13 }
0x19bd   :  { %2967 = vrot.lane.b32.xlu1 %v4391_v0, %s3929_s20 }
0x19c1   :  { %2522 = vrot.lane.b32.xlu1 %v4389_v55, %s3929_s20 }
0x1a2d   :  { %v2796_v3 = vpop.xlane.xlu1 %2795 }
0x1a2e   :  { %v2797_v58 = vsub.f32 %v2793_v30, %v2796_v3 }
0x1a30   :  { %v2798_v59 = vmul.f32 1.442695, %v2797_v58 }
0x1a31   :  { %v2884_v60 = vpop.permute.xlu1 %2883 }
0x1a32   :  { %3880 = vpow2.f32 %v2798_v59 }
0x1a35   :  { %v2362_v61 = vpop.permute.xlu1 %2361 }
0x1a36   :  { %3537 = vmatpush3.msra.mxu0 %v2362_v61 }
0x1a37   :  { %3539 = vmatmul.mubr.msk.f32.vlgmr.msra.gmra.mrb[20].mxu0 %vm2364_vm2, %v4446_v42  ;;  %3738 = vmatprep.subr.bf16.mxu0 %v3921_v15 }
0x1a38   :  { %3570 = vmatprep.mubr.msk.f32.mxu0 %vm3922_vm6, %v3920_v9 }
0x1a3c   :  { %v3881_v62 = vpop.eup %3880 }
0x1a3d   :  { %v2800_v0 = vsel %vm41_vm12, %v3881_v62, 0.0  ;;  %vm3080_vm12 = vcmask 60416  }
0x1a3e   :  { %2801 = vadd.xlane.f32.xlu0 %v2800_v0 }
0x1a54   :  { %2806 = vrot.lane.b32.xlu0 %v4436_v23, %s3928_s19  ;;  %v3739_v23 = vpack.c.bf16 %v2167_v21, %v2166_v18 }
0x1a56   :  { %3740 = vmatpush3.bf16.msra.mxu0 %v3739_v23 }
0x1a57   :  { %3741 = vmatprep.subr.bf16.mxu0 %v3921_v15 }
0x1a58   :  { %2515 = vrot.lane.b32.xlu0 %v2510_v46, %s3930_s21 }
0x1acb   :  { %v2802_v55 = vpop.xlane.xlu0 %2801 }
0x1acc   :  { %3882 = vrcp.f32 %v2802_v55 }
0x1acf   :  { %v2807_v63 = vpop.permute.xlu0 %2806 }
0x1ad0   :  { %3584 = vmatpush3.msra.mxu1 %v2807_v63 }
0x1ad1   :  { %3588 = vmatprep.subr.mxu1 %v3920_v9 }
0x1ad3   :  { %v2516_v16 = vpop.permute.xlu0 %2515 }
0x1ad6   :  { %v3883_v1 = vpop.eup %3882 }
0x1ad7   :  { %v2804_v2 = vmul.f32 %v3883_v1, %v3881_v62 }
0x1ad9   :  { %3586 = vmatmul.mubr.msk.f32.vlgmr.msra.gmra.mrb[28].mxu1 %vm2364_vm2, %v2804_v2  ;;  %v3070_v5 = vrot.slane %v2804_v2, 7  ;;  %v2882_v8 = vrot.slane %v2804_v2, 1  ;;  %v3074_v11 = vrot.slane %v2804_v2, 6 }
0x1ada   :  { %3589 = vmatpush3.msra.mxu1 %v2884_v60  ;;  %3590 = vmatprep.mubr.msk.f32.mxu1 %vm3922_vm6, %v3920_v9 }
0x1adb   :  { %3756 = vmatprep.subr.bf16.mxu1 %v3921_v15  ;;  %v3076_v13 = vsel %vm2338_vm9, %v4446_v42, %v3070_v5 }
0x1adc   :  { %v3077_v14 = vsel %vm384_vm4, %v3076_v13, %v3072_v6  ;;  %vm2602_vm4 = vcmask 253952  }
0x1add   :  { %3591 = vmatmul.mubr.msk.f32.vlgmr.msra.gmra.mrb[30].mxu1 %vm2364_vm2, %v2882_v8  ;;  %v3079_v20 = vsel %vm3078_vm11, %v3077_v14, %v3074_v11  ;;  %v2178_v14 = vld [vmem:[%s4589_s5 + $0x116] sm:$0x1] }
0x1ade   :  { %3617 = vmatprep.mubr.msk.f32.mxu1 %vm3922_vm6, %v3920_v9  ;;  %3081 = vst.msk [vmem:[#allocation2] sm:$0xf] %vm3080_vm12, %v3079_v20  ;;  %v2169_v9 = vld [vmem:[%s4589_s5 + $0xc8] sm:$0xff]  ;;  %3758 = vmatpush3.bf16.msra.mxu1 %v3739_v23  ;;  %vm2528_vm6 = vcmask 785408  }
0x1adf   :  { %v3742_v24 = vpack.c.bf16 %v2169_v9, %v2168_v22  ;;  %3759 = vmatprep.subr.bf16.mxu1 %v3921_v15 }
0x1ae1   :  { %3743 = vmatpush3.bf16.msra.mxu0 %v3742_v24 }
0x1ae2   :  { %3761 = vmatpush3.bf16.msra.mxu1 %v3742_v24  ;;  %3744 = vmatprep.subr.bf16.mxu0 %v3921_v15 }
0x1ae3   :  { %3762 = vmatprep.subr.bf16.mxu1 %v3921_v15 }
0x1ae5   :  { %3746 = vmatpush3.bf16.msra.mxu0 %v3745_v28 }
0x1ae6   :  { %3764 = vmatpush3.bf16.msra.mxu1 %v3745_v28  ;;  %3747 = vmatprep.subr.bf16.mxu0 %v3921_v15 }
0x1ae7   :  { %3765 = vmatprep.subr.bf16.mxu1 %v3921_v15 }
0x1ae9   :  { %3749 = vmatpush3.bf16.msra.mxu0 %v3748_v34 }
0x1aea   :  { %3767 = vmatpush3.bf16.msra.mxu1 %v3748_v34  ;;  %3750 = vmatprep.subr.bf16.mxu0 %v3921_v15 }
0x1aeb   :  { %3768 = vmatprep.subr.bf16.mxu1 %v3921_v15 }
0x1aed   :  { %3752 = vmatpush3.bf16.msra.mxu0 %v3751_v12 }
0x1aee   :  { %3770 = vmatpush3.bf16.msra.mxu1 %v3751_v12  ;;  %3753 = vmatprep.subr.bf16.mxu0 %v3921_v15 }
0x1aef   :  { %3771 = vmatprep.subr.bf16.mxu1 %v3921_v15  ;;  %v2965_v15 = vpop.permute.xlu1 %2964 }
0x1af1   :  { %3755 = vmatpush3.bf16.msra.mxu0 %v3754_v37 }
0x1af2   :  { %3773 = vmatpush3.bf16.msra.mxu1 %v3754_v37 }
0x1af3   :  { %v2968_v40 = vpop.permute.xlu1 %2967 }
0x1af7   :  { %v2523_v48 = vpop.permute.xlu1 %2522 }
0x1b0a   :  { %v2434_v17 = vpop.f32.mrb[20].mxu0 }
0x1b0b   :  { %v3540_v26 = vpop.f32.mrb[21].mxu0  ;;  %v2518_v46 = vsel %vm658_vm1, %v2434_v17, %v2516_v16  ;;  %v2179_v17 = vld [vmem:[%s4589_s5 + $0x117] sm:$0x1] }
0x1bac   :  { %v2878_v38 = vpop.f32.mrb[28].mxu1 }
0x1bad   :  { %v3587_v4 = vpop.f32.mrb[29].mxu1 }
0x1bb0   :  { %v2954_v39 = vpop.f32.mrb[30].mxu1 }
0x1bb1   :  { %2959 = vrot.lane.b32.xlu0 %v2954_v39, %s3930_s21  ;;  %v3592_v19 = vpop.f32.mrb[31].mxu1 }
0x1bb5   :  { %2519 = vrot.lane.b32.xlu0 %v4375_v41, %s3925_s13 }
0x1c23   :  { %v2960_v42 = vpop.permute.xlu0 %2959 }
0x1c24   :  { %v2962_v43 = vsel %vm658_vm1, %v2878_v38, %v2960_v42 }
0x1c25   :  { %v2970_v44 = vsel %vm175_vm7, %v2962_v43, %v2965_v15 }
0x1c26   :  { %v2971_v45 = vsel %vm1891_vm8, %v2970_v44, %v2968_v40 }
0x1c27   :  { %3618 = vmatmul.mubr.msk.f32.vlgmr.msra.gmra.mrb[32].mxu1 %vm2528_vm6, %v2971_v45  ;;  %v2520_v47 = vpop.permute.xlu0 %2519 }
0x1c28   :  { %v2525_v49 = vsel %vm175_vm7, %v2518_v46, %v2520_v47 }
0x1c29   :  { %v2526_v41 = vsel %vm1891_vm8, %v2525_v49, %v2523_v48 }
0x1c2a   :  { %3571 = vmatmul.mubr.msk.f32.vlgmr.msra.gmra.mrb[22].mxu0 %vm2528_vm6, %v2526_v41 }
0x1cfa   :  { %v3041_v51 = vpop.f32.mrb[32].mxu1 }
0x1cfb   :  { %v3042_v52 = vadd.f32 %v3041_v51, %v2527_v50  ;;  %v3619_v53 = vpop.f32.mrb[33].mxu1 }
0x1cfd   :  { %v2598_v31 = vpop.f32.mrb[22].mxu0  ;;  %v3045_v29 = vsel %vm2602_vm4, %v3042_v52, 0.0 }
0x1cfe   :  { %v2599_v54 = vadd.f32 %v2598_v31, %v2527_v50  ;;  %3046 = vadd.xlane.f32.xlu0 %v3045_v29  ;;  %v3572_v30 = vpop.f32.mrb[23].mxu0 }
0x1d00   :  { %v2603_v56 = vsel %vm2602_vm4, %v2599_v54, 0.0 }
0x1d01   :  { %2604 = vadd.xlane.f32.xlu1 %v2603_v56 }
0x1d8b   :  { %v3047_v57 = vpop.xlane.xlu0 %3046 }
0x1d8c   :  { %v3048_v3 = vmul.f32 0.03125, %v3047_v57 }
0x1d8e   :  { %v3049_v58 = vsub.f32 %v3042_v52, %v3048_v3  ;;  %v2605_v59 = vpop.xlane.xlu1 %2604 }
0x1d8f   :  { %v2607_v60 = vmul.f32 0.03125, %v2605_v59 }
0x1d90   :  { %v3050_v61 = vmul.f32 %v3049_v58, %v3049_v58 }
0x1d91   :  { %v2608_v62 = vsub.f32 %v2599_v54, %v2607_v60 }
0x1d92   :  { %v3051_v0 = vsel %vm2602_vm4, %v3050_v61, 0.0 }
0x1d93   :  { %3052 = vadd.xlane.f32.xlu0 %v3051_v0  ;;  %v2609_v55 = vmul.f32 %v2608_v62, %v2608_v62 }
0x1d95   :  { %v2610_v63 = vsel %vm2602_vm4, %v2609_v55, 0.0 }
0x1d97   :  { %2611 = vadd.xlane.f32.xlu0 %v2610_v63 }
0x1e20   :  { %v3053_v1 = vpop.xlane.xlu0 %3052 }
0x1e21   :  { %v3054_v2 = vmul.f32 0.03125, %v3053_v1 }
0x1e23   :  { %v3055_v5 = vadd.f32 1e-05, %v3054_v2 }
0x1e24   :  { %v2612_v6 = vpop.xlane.xlu0 %2611 }
0x1e25   :  { %3884 = vrsqrt.f32 %v3055_v5  ;;  %v2613_v8 = vmul.f32 0.03125, %v2612_v6 }
0x1e27   :  { %v2614_v11 = vadd.f32 1e-05, %v2613_v8 }
0x1e29   :  { %3886 = vrsqrt.f32 %v2614_v11 }
0x1e2f   :  { %v3885_v13 = vpop.eup %3884 }
0x1e30   :  { %v3057_v20 = vmul.f32 %v3885_v13, %v3049_v58 }
0x1e32   :  { %v3058_v26 = vmul.f32 %v3057_v20, %v2178_v14 }
0x1e33   :  { %v3887_v18 = vpop.eup %3886 }
0x1e34   :  { %v3059_v21 = vadd.f32 %v3058_v26, %v2179_v17  ;;  %v2616_v22 = vmul.f32 %v3887_v18, %v2608_v62 }
0x1e36   :  { %v3061_v23 = vmul.f32 0.70710677, %v3059_v21  ;;  %v2617_v9 = vmul.f32 %v2616_v22, %v2178_v14  ;;  %v3060_v28 = vmul.f32 0.5, %v3059_v21 }
0x1e38   :  { %3888 = verf.f32 %v3061_v23  ;;  %v2618_v24 = vadd.f32 %v2617_v9, %v2179_v17 }
0x1e3a   :  { %v2620_v25 = vmul.f32 0.70710677, %v2618_v24  ;;  %v2619_v12 = vmul.f32 0.5, %v2618_v24 }
0x1e3c   :  { %3890 = verf.f32 %v2620_v25 }
0x1e42   :  { %v3889_v27 = vpop.eup %3888 }
0x1e43   :  { %v3063_v7 = vadd.f32 1.0, %v3889_v27 }
0x1e45   :  { %v3064_v34 = vmul.f32 %v3063_v7, %v3060_v28 }
0x1e46   :  { %v3891_v35 = vpop.eup %3890 }
0x1e47   :  { %v3065_v36 = vmul.f32 %v3064_v34, %v2180_v32  ;;  %v2622_v33 = vadd.f32 1.0, %v3891_v35 }
0x1e49   :  { %v3066_v10 = vsel %vm2602_vm4, %v3065_v36, 0.0  ;;  %v2623_v37 = vmul.f32 %v2622_v33, %v2619_v12 }
0x1e4a   :  { %3067 = vadd.xlane.f32.xlu0 %v3066_v10 }
0x1e4b   :  { %v2624_v38 = vmul.f32 %v2623_v37, %v2180_v32 }
0x1e4d   :  { %v2625_v4 = vsel %vm2602_vm4, %v2624_v38, 0.0 }
0x1e4e   :  { %2626 = vadd.xlane.f32.xlu1 %v2625_v4 }
0x1e4f   :  { %3906 = shalt.err (!%p3903_p4)
}
0x1e50   :  { %s3907_s9 = scalar_lea.hbm %s4591_s7, 64 }
0x1e51   :  { %p3908_p5 = scmp.ne.s32.totalorder %s4591_s7, %s3907_s9  ;;  %p3911_p6 = scmp.lt.u32.totalorder %s3907_s9, %s4591_s7 }
0x1e53   :  { %p3913_p7 = pnand %p3911_p6, %p3908_p5 }
0x1e55   :  { %3916 = shalt.err (!%p3913_p7)
}
0x1e56   :  { %3101 = dma.vmem_to_hbm [thread:$0]  %s3099_s27, 64, %s4591_s7, [#allocation3]   ;;  %v3893_v19 = vld [vmem:[%s4589_s5 + $0x125] sm:$0x1]  ;;  %vm3090_vm7 = vcmask 1024  }
0x1e57   :  { %s3932_s15 = smov 126  }
0x1ed7   :  { %v3068_v39 = vpop.xlane.xlu0 %3067 }
0x1ed8   :  { %v3069_v15 = vadd.f32 %v3893_v19, %v3068_v39 }
0x1eda   :  { %v3083_v40 = vrot.slane %v3069_v15, 7 }
0x1edb   :  { %v2627_v16 = vpop.xlane.xlu1 %2626 }
0x1edc   :  { %v2628_v42 = vadd.f32 %v3893_v19, %v2627_v16 }
0x1ede   :  { %v3085_v43 = vsel %vm2338_vm9, %v2628_v42, %v3083_v40 }
0x1edf   :  { %3087 = vrot.lane.b32.xlu0 %v3085_v43, %s3932_s15 }
0x1f51   :  { %v3088_v44 = vpop.permute.xlu0 %3087 }
0x1f52   :  { %3091 = vst.msk [vmem:[%s4592_s8] sm:$0x3] %vm3090_vm7, %v3088_v44 }
0x1f53   :  { %3917 = dma.done.wait [#allocation3], 64  }
0x1f54   :  { %3918 = vsyncadd [#allocation3], 4294967232 }
0x1f55   :  { %3109 = vsyncpa [#allocation3], 1 }

</bundles_post_ra>
